<compile_context>
chip_gen: v7x
topology: tpu7x:2x2x1
jax: 0.10.0
libtpu: 0.0.40
codegen_flags: <defaults>
</compile_context>

<pallas_src>
import functools
import math

import jax
import jax.numpy as jnp
from jax import lax
from jax.experimental import pallas as pl
from jax.experimental.pallas import tpu as pltpu


# ---------------------------------------------------------------------------
# Kernels
# ---------------------------------------------------------------------------
def _conv3x3_relu_kernel(x_ref, w_ref, b_ref, o_ref, *, H, W):
    """3x3 'same' conv + bias + ReLU for one image (NHWC, pre-padded input).

    x_ref: (1, H+2, W+2, Cin)   zero-padded image
    w_ref: (3, 3, Cin, Cout)
    b_ref: (1, Cout)
    o_ref: (1, H, W, Cout)
    """
    cin = x_ref.shape[-1]
    cout = o_ref.shape[-1]
    acc = jnp.zeros((H * W, cout), jnp.float32)
    # 9 shifted-window matmuls on the MXU, accumulated in f32.
    for dy in range(3):
        for dx in range(3):
            patch = x_ref[0, dy:dy + H, dx:dx + W, :]          # (H, W, Cin)
            acc = acc + jnp.dot(
                patch.reshape(H * W, cin).astype(jnp.float32),
                w_ref[dy, dx].astype(jnp.float32),
                preferred_element_type=jnp.float32,
            )
    acc = acc + b_ref[...].astype(jnp.float32)                 # broadcast (1, Cout)
    o_ref[0] = jnp.maximum(acc, 0.0).reshape(H, W, cout).astype(o_ref.dtype)


def _maxpool2x2_kernel(x_ref, o_ref):
    """2x2 / stride-2 max pool for one image.

    x_ref: (1, Ho, 2, Wo, 2*C)  -- NHWC image reshaped (free reshape) so each
                                   output pixel's 2x2 window lives in axis 2
                                   (H pair) and the two lane halves (W pair).
    o_ref: (1, Ho, Wo, C)
    """
    c = o_ref.shape[-1]
    x = x_ref[0]                                    # (Ho, 2, Wo, 2C)
    m = jnp.maximum(x[:, 0], x[:, 1])               # pool along H -> (Ho, Wo, 2C)
    o_ref[0] = jnp.maximum(m[..., :c], m[..., c:]).astype(o_ref.dtype)  # pool along W


def _head_kernel(x_ref, w_ref, b_ref, o_ref):
    """AdaptiveAvgPool2d((1,1)) + Flatten + Linear(C,1) + Sigmoid (whole batch).

    x_ref: (N, Hf, Wf, C);  w_ref: (1, C);  b_ref: (1, 1);  o_ref: (N, 1)
    """
    hf, wf = x_ref.shape[1], x_ref.shape[2]
    x = x_ref[...].astype(jnp.float32)              # (N, Hf, Wf, C)
    s = jnp.sum(x, axis=1)                          # (N, Wf, C)
    s = jnp.sum(s, axis=1)                          # (N, C)
    m = s * (1.0 / float(hf * wf))                  # global average pool
    z = jnp.sum(m * w_ref[...].astype(jnp.float32), axis=-1, keepdims=True)
    z = z + b_ref[...].astype(jnp.float32)          # (N, 1)
    o_ref[...] = (1.0 / (1.0 + jnp.exp(-z))).astype(o_ref.dtype)


# ---------------------------------------------------------------------------
# Pallas wrappers
# ---------------------------------------------------------------------------
def conv3x3_relu(x, w, b):
    """x: (N,H,W,Cin) f32, w: (3,3,Cin,Cout), b: (Cout,) -> (N,H,W,Cout)."""
    n, h, wd, cin = x.shape
    cout = w.shape[-1]
    xp = jnp.pad(x, ((0, 0), (1, 1), (1, 1), (0, 0)))      # conv 'same' padding
    b2 = b.reshape(1, cout)
    flops = int(2 * n * h * wd * 9 * cin * cout)
    bytes_accessed = int(4 * (xp.size + w.size + b.size + n * h * wd * cout))
    return pl.pallas_call(
        functools.partial(_conv3x3_relu_kernel, H=h, W=wd),
        out_shape=jax.ShapeDtypeStruct((n, h, wd, cout), x.dtype),
        grid=(n,),
        in_specs=[
            pl.BlockSpec((1, h + 2, wd + 2, cin), lambda i: (i, 0, 0, 0)),
            pl.BlockSpec((3, 3, cin, cout), lambda i: (0, 0, 0, 0)),
            pl.BlockSpec((1, cout), lambda i: (0, 0)),
        ],
        out_specs=pl.BlockSpec((1, h, wd, cout), lambda i: (i, 0, 0, 0)),
        compiler_params=pltpu.CompilerParams(dimension_semantics=("parallel",)),
        cost_estimate=pl.CostEstimate(flops=flops, transcendentals=0,
                                      bytes_accessed=bytes_accessed),
    )(xp, w, b2)


def maxpool2x2(x):
    """x: (N,H,W,C) -> (N,H/2,W/2,C)."""
    n, h, wd, c = x.shape
    assert h % 2 == 0 and wd % 2 == 0
    ho, wo = h // 2, wd // 2
    xr = x.reshape(n, ho, 2, wo, 2 * c)          # free row-major reshape
    return pl.pallas_call(
        _maxpool2x2_kernel,
        out_shape=jax.ShapeDtypeStruct((n, ho, wo, c), x.dtype),
        grid=(n,),
        in_specs=[pl.BlockSpec((1, ho, 2, wo, 2 * c), lambda i: (i, 0, 0, 0, 0))],
        out_specs=pl.BlockSpec((1, ho, wo, c), lambda i: (i, 0, 0, 0)),
        compiler_params=pltpu.CompilerParams(dimension_semantics=("parallel",)),
    )(xr)


def head(x, w_out, b_out):
    """Global avg pool + Linear(C,1) + Sigmoid.  x: (N,Hf,Wf,C) -> (N,1)."""
    n, _, _, c = x.shape
    w2 = w_out.reshape(1, c).astype(jnp.float32)
    b2 = jnp.reshape(b_out, (1, 1)).astype(jnp.float32)
    return pl.pallas_call(
        _head_kernel,
        out_shape=jax.ShapeDtypeStruct((n, 1), x.dtype),
    )(x, w2, b2)


# ---------------------------------------------------------------------------
# Model: replicate FlexibleDecoder._make_layers bookkeeping
# ---------------------------------------------------------------------------
def build_plan(total_conv_layers=5, total_pool_layers=2, initial_channels=64,
               convs_per_block=None, channel_growth="double"):
    if convs_per_block is None:
        convs_per_block = (math.ceil(total_conv_layers / total_pool_layers)
                           if total_pool_layers > 0 else total_conv_layers)
    plan = []
    in_channels = 3
    current = initial_channels
    conv_rem = total_conv_layers
    pool_rem = total_pool_layers
    while conv_rem > 0:
        for _ in range(min(convs_per_block, conv_rem)):
            plan.append(("conv", in_channels, current))
            in_channels = current
            conv_rem -= 1
        if pool_rem > 0:
            plan.append(("pool", 0, 0))
            pool_rem -= 1
        if conv_rem > 0:
            if channel_growth == "double":
                current *= 2
            elif channel_growth == "linear":
                current += initial_channels
    return plan, in_channels        # final_num_channels == in_channels


def init_params(key, plan, final_channels):
    convs = []
    for kind, cin, cout in plan:
        if kind != "conv":
            continue
        key, kw = jax.random.split(key)
        w = jax.random.normal(kw, (3, 3, cin, cout), jnp.float32) * math.sqrt(2.0 / (9 * cin))
        b = jnp.zeros((cout,), jnp.float32)
        convs.append((w, b))
    key, kl = jax.random.split(key)
    w_out = jax.random.normal(kl, (final_channels,), jnp.float32) * math.sqrt(1.0 / final_channels)
    b_out = jnp.zeros((), jnp.float32)
    return {"convs": convs, "w_out": w_out, "b_out": b_out}


def flexible_decoder_forward(params, x_nchw, plan):
    x = jnp.transpose(x_nchw, (0, 2, 3, 1))     # NCHW -> NHWC once (lane-dense C)
    ci = 0
    for kind, _, _ in plan:
        if kind == "conv":
            w, b = params["convs"][ci]
            ci += 1
            x = conv3x3_relu(x, w, b)
        else:
            x = maxpool2x2(x)
    return head(x, params["w_out"], params["b_out"])   # (N, 1)


# ---------------------------------------------------------------------------
# Pure-JAX reference (for correctness check)
# ---------------------------------------------------------------------------
def reference_forward(params, x_nchw, plan):
    x = jnp.transpose(x_nchw, (0, 2, 3, 1))
    ci = 0
    for kind, _, _ in plan:
        if kind == "conv":
            w, b = params["convs"][ci]
            ci += 1
            x = lax.conv_general_dilated(x, w, window_strides=(1, 1), padding="SAME",
                                         dimension_numbers=("NHWC", "HWIO", "NHWC"))
            x = jnp.maximum(x + b, 0.0)
        else:
            x = lax.reduce_window(x, -jnp.inf, lax.max,
                                  (1, 2, 2, 1), (1, 2, 2, 1), "VALID")
    m = jnp.mean(x, axis=(1, 2))
    z = m @ params["w_out"].reshape(-1, 1) + params["b_out"]
    return jax.nn.sigmoid(z)


if __name__ == "__main__":
    # Default FlexibleDecoder config: 5 convs, 2 pools, 64 -> 128 channels.
    plan, final_c = build_plan()

    key = jax.random.PRNGKey(0)
    key, kx = jax.random.split(key)
    x = jax.random.normal(kx, (2, 3, 16, 16), dtype=jnp.float32)   # NCHW like PyTorch
    params = init_params(key, plan, final_c)

    y = flexible_decoder_forward(params, x, plan)
    y = jax.block_until_ready(y)

    assert y.shape == (2, 1) and y.dtype == jnp.float32
    assert bool(jnp.all((y > 0.0) & (y < 1.0)))

    y_ref = reference_forward(params, x, plan)
    assert bool(jnp.allclose(y, y_ref, rtol=1e-4, atol=1e-4)), (y, y_ref)

    print("KERNEL_OK")
</pallas_src>

<mosaic_0001>
module attributes {stable_mosaic.version = 11 : i64} {
  func.func @_conv3x3_relu_kernel(%arg0: i32, %arg1: memref<1x18x18x3xf32, #tpu.memory_space<vmem>>, %arg2: memref<3x3x3x64xf32, #tpu.memory_space<vmem>>, %arg3: memref<1x64xf32, #tpu.memory_space<vmem>>, %arg4: memref<1x16x16x64xf32, #tpu.memory_space<vmem>>) attributes {dimension_semantics = [#tpu.dimension_semantics<parallel>], iteration_bounds = array<i64: 2>, scalar_prefetch = 0 : i64, scratch_operands = 0 : i64, tpu.core_type = #tpu.core_type<tc>, window_params = [{transform_indices = @transform_0, window_bounds = array<i64: 1, 18, 18, 3>}, {pipeline_mode = #tpu.pipeline_mode<synchronous>, transform_indices = @transform_1, window_bounds = array<i64: 3, 3, 3, 64>}, {pipeline_mode = #tpu.pipeline_mode<synchronous>, transform_indices = @transform_2, window_bounds = array<i64: 1, 64>}, {transform_indices = @transform_3, window_bounds = array<i64: 1, 16, 16, 64>}]} {
    %cst = arith.constant 0.000000e+00 : f32
    %0 = vector.broadcast %cst : f32 to vector<256x64xf32>
    %c0 = arith.constant 0 : index
    %c0_0 = arith.constant 0 : index
    %c0_1 = arith.constant 0 : index
    %c0_2 = arith.constant 0 : index
    %1 = vector.load %arg1[%c0, %c0_0, %c0_1, %c0_2] : memref<1x18x18x3xf32, #tpu.memory_space<vmem>>, vector<1x16x16x3xf32>
    %2 = vector.shape_cast %1 : vector<1x16x16x3xf32> to vector<16x16x3xf32>
    %3 = vector.shape_cast %2 : vector<16x16x3xf32> to vector<256x3xf32>
    %c0_3 = arith.constant 0 : index
    %c0_4 = arith.constant 0 : index
    %c0_5 = arith.constant 0 : index
    %c0_6 = arith.constant 0 : index
    %4 = vector.load %arg2[%c0_3, %c0_4, %c0_5, %c0_6] : memref<3x3x3x64xf32, #tpu.memory_space<vmem>>, vector<1x1x3x64xf32>
    %5 = vector.shape_cast %4 : vector<1x1x3x64xf32> to vector<3x64xf32>
    %cst_7 = arith.constant dense<0.000000e+00> : vector<256x64xf32>
    %6 = tpu.matmul %3, %5, %cst_7 {dimension_numbers = #tpu.dot_dimension_numbers<[1], [0], [0], [1], [0, 0, 1, 1], [], []>} : vector<256x3xf32>, vector<3x64xf32>, vector<256x64xf32> -> vector<256x64xf32>
    %7 = arith.addf %0, %6 : vector<256x64xf32>
    %c0_8 = arith.constant 0 : index
    %c0_9 = arith.constant 0 : index
    %c1 = arith.constant 1 : index
    %c0_10 = arith.constant 0 : index
    %8 = vector.load %arg1[%c0_8, %c0_9, %c1, %c0_10] : memref<1x18x18x3xf32, #tpu.memory_space<vmem>>, vector<1x16x16x3xf32>
    %9 = vector.shape_cast %8 : vector<1x16x16x3xf32> to vector<16x16x3xf32>
    %10 = vector.shape_cast %9 : vector<16x16x3xf32> to vector<256x3xf32>
    %c0_11 = arith.constant 0 : index
    %c1_12 = arith.constant 1 : index
    %c0_13 = arith.constant 0 : index
    %c0_14 = arith.constant 0 : index
    %11 = vector.load %arg2[%c0_11, %c1_12, %c0_13, %c0_14] : memref<3x3x3x64xf32, #tpu.memory_space<vmem>>, vector<1x1x3x64xf32>
    %12 = vector.shape_cast %11 : vector<1x1x3x64xf32> to vector<3x64xf32>
    %cst_15 = arith.constant dense<0.000000e+00> : vector<256x64xf32>
    %13 = tpu.matmul %10, %12, %cst_15 {dimension_numbers = #tpu.dot_dimension_numbers<[1], [0], [0], [1], [0, 0, 1, 1], [], []>} : vector<256x3xf32>, vector<3x64xf32>, vector<256x64xf32> -> vector<256x64xf32>
    %14 = arith.addf %7, %13 : vector<256x64xf32>
    %c0_16 = arith.constant 0 : index
    %c0_17 = arith.constant 0 : index
    %c2 = arith.constant 2 : index
    %c0_18 = arith.constant 0 : index
    %15 = vector.load %arg1[%c0_16, %c0_17, %c2, %c0_18] : memref<1x18x18x3xf32, #tpu.memory_space<vmem>>, vector<1x16x16x3xf32>
    %16 = vector.shape_cast %15 : vector<1x16x16x3xf32> to vector<16x16x3xf32>
    %17 = vector.shape_cast %16 : vector<16x16x3xf32> to vector<256x3xf32>
    %c0_19 = arith.constant 0 : index
    %c2_20 = arith.constant 2 : index
    %c0_21 = arith.constant 0 : index
    %c0_22 = arith.constant 0 : index
    %18 = vector.load %arg2[%c0_19, %c2_20, %c0_21, %c0_22] : memref<3x3x3x64xf32, #tpu.memory_space<vmem>>, vector<1x1x3x64xf32>
    %19 = vector.shape_cast %18 : vector<1x1x3x64xf32> to vector<3x64xf32>
    %cst_23 = arith.constant dense<0.000000e+00> : vector<256x64xf32>
    %20 = tpu.matmul %17, %19, %cst_23 {dimension_numbers = #tpu.dot_dimension_numbers<[1], [0], [0], [1], [0, 0, 1, 1], [], []>} : vector<256x3xf32>, vector<3x64xf32>, vector<256x64xf32> -> vector<256x64xf32>
    %21 = arith.addf %14, %20 : vector<256x64xf32>
    %c0_24 = arith.constant 0 : index
    %c1_25 = arith.constant 1 : index
    %c0_26 = arith.constant 0 : index
    %c0_27 = arith.constant 0 : index
    %22 = vector.load %arg1[%c0_24, %c1_25, %c0_26, %c0_27] : memref<1x18x18x3xf32, #tpu.memory_space<vmem>>, vector<1x16x16x3xf32>
    %23 = vector.shape_cast %22 : vector<1x16x16x3xf32> to vector<16x16x3xf32>
    %24 = vector.shape_cast %23 : vector<16x16x3xf32> to vector<256x3xf32>
    %c1_28 = arith.constant 1 : index
    %c0_29 = arith.constant 0 : index
    %c0_30 = arith.constant 0 : index
    %c0_31 = arith.constant 0 : index
    %25 = vector.load %arg2[%c1_28, %c0_29, %c0_30, %c0_31] : memref<3x3x3x64xf32, #tpu.memory_space<vmem>>, vector<1x1x3x64xf32>
    %26 = vector.shape_cast %25 : vector<1x1x3x64xf32> to vector<3x64xf32>
    %cst_32 = arith.constant dense<0.000000e+00> : vector<256x64xf32>
    %27 = tpu.matmul %24, %26, %cst_32 {dimension_numbers = #tpu.dot_dimension_numbers<[1], [0], [0], [1], [0, 0, 1, 1], [], []>} : vector<256x3xf32>, vector<3x64xf32>, vector<256x64xf32> -> vector<256x64xf32>
    %28 = arith.addf %21, %27 : vector<256x64xf32>
    %c0_33 = arith.constant 0 : index
    %c1_34 = arith.constant 1 : index
    %c1_35 = arith.constant 1 : index
    %c0_36 = arith.constant 0 : index
    %29 = vector.load %arg1[%c0_33, %c1_34, %c1_35, %c0_36] : memref<1x18x18x3xf32, #tpu.memory_space<vmem>>, vector<1x16x16x3xf32>
    %30 = vector.shape_cast %29 : vector<1x16x16x3xf32> to vector<16x16x3xf32>
    %31 = vector.shape_cast %30 : vector<16x16x3xf32> to vector<256x3xf32>
    %c1_37 = arith.constant 1 : index
    %c1_38 = arith.constant 1 : index
    %c0_39 = arith.constant 0 : index
    %c0_40 = arith.constant 0 : index
    %32 = vector.load %arg2[%c1_37, %c1_38, %c0_39, %c0_40] : memref<3x3x3x64xf32, #tpu.memory_space<vmem>>, vector<1x1x3x64xf32>
    %33 = vector.shape_cast %32 : vector<1x1x3x64xf32> to vector<3x64xf32>
    %cst_41 = arith.constant dense<0.000000e+00> : vector<256x64xf32>
    %34 = tpu.matmul %31, %33, %cst_41 {dimension_numbers = #tpu.dot_dimension_numbers<[1], [0], [0], [1], [0, 0, 1, 1], [], []>} : vector<256x3xf32>, vector<3x64xf32>, vector<256x64xf32> -> vector<256x64xf32>
    %35 = arith.addf %28, %34 : vector<256x64xf32>
    %c0_42 = arith.constant 0 : index
    %c1_43 = arith.constant 1 : index
    %c2_44 = arith.constant 2 : index
    %c0_45 = arith.constant 0 : index
    %36 = vector.load %arg1[%c0_42, %c1_43, %c2_44, %c0_45] : memref<1x18x18x3xf32, #tpu.memory_space<vmem>>, vector<1x16x16x3xf32>
    %37 = vector.shape_cast %36 : vector<1x16x16x3xf32> to vector<16x16x3xf32>
    %38 = vector.shape_cast %37 : vector<16x16x3xf32> to vector<256x3xf32>
    %c1_46 = arith.constant 1 : index
    %c2_47 = arith.constant 2 : index
    %c0_48 = arith.constant 0 : index
    %c0_49 = arith.constant 0 : index
    %39 = vector.load %arg2[%c1_46, %c2_47, %c0_48, %c0_49] : memref<3x3x3x64xf32, #tpu.memory_space<vmem>>, vector<1x1x3x64xf32>
    %40 = vector.shape_cast %39 : vector<1x1x3x64xf32> to vector<3x64xf32>
    %cst_50 = arith.constant dense<0.000000e+00> : vector<256x64xf32>
    %41 = tpu.matmul %38, %40, %cst_50 {dimension_numbers = #tpu.dot_dimension_numbers<[1], [0], [0], [1], [0, 0, 1, 1], [], []>} : vector<256x3xf32>, vector<3x64xf32>, vector<256x64xf32> -> vector<256x64xf32>
    %42 = arith.addf %35, %41 : vector<256x64xf32>
    %c0_51 = arith.constant 0 : index
    %c2_52 = arith.constant 2 : index
    %c0_53 = arith.constant 0 : index
    %c0_54 = arith.constant 0 : index
    %43 = vector.load %arg1[%c0_51, %c2_52, %c0_53, %c0_54] : memref<1x18x18x3xf32, #tpu.memory_space<vmem>>, vector<1x16x16x3xf32>
    %44 = vector.shape_cast %43 : vector<1x16x16x3xf32> to vector<16x16x3xf32>
    %45 = vector.shape_cast %44 : vector<16x16x3xf32> to vector<256x3xf32>
    %c2_55 = arith.constant 2 : index
    %c0_56 = arith.constant 0 : index
    %c0_57 = arith.constant 0 : index
    %c0_58 = arith.constant 0 : index
    %46 = vector.load %arg2[%c2_55, %c0_56, %c0_57, %c0_58] : memref<3x3x3x64xf32, #tpu.memory_space<vmem>>, vector<1x1x3x64xf32>
    %47 = vector.shape_cast %46 : vector<1x1x3x64xf32> to vector<3x64xf32>
    %cst_59 = arith.constant dense<0.000000e+00> : vector<256x64xf32>
    %48 = tpu.matmul %45, %47, %cst_59 {dimension_numbers = #tpu.dot_dimension_numbers<[1], [0], [0], [1], [0, 0, 1, 1], [], []>} : vector<256x3xf32>, vector<3x64xf32>, vector<256x64xf32> -> vector<256x64xf32>
    %49 = arith.addf %42, %48 : vector<256x64xf32>
    %c0_60 = arith.constant 0 : index
    %c2_61 = arith.constant 2 : index
    %c1_62 = arith.constant 1 : index
    %c0_63 = arith.constant 0 : index
    %50 = vector.load %arg1[%c0_60, %c2_61, %c1_62, %c0_63] : memref<1x18x18x3xf32, #tpu.memory_space<vmem>>, vector<1x16x16x3xf32>
    %51 = vector.shape_cast %50 : vector<1x16x16x3xf32> to vector<16x16x3xf32>
    %52 = vector.shape_cast %51 : vector<16x16x3xf32> to vector<256x3xf32>
    %c2_64 = arith.constant 2 : index
    %c1_65 = arith.constant 1 : index
    %c0_66 = arith.constant 0 : index
    %c0_67 = arith.constant 0 : index
    %53 = vector.load %arg2[%c2_64, %c1_65, %c0_66, %c0_67] : memref<3x3x3x64xf32, #tpu.memory_space<vmem>>, vector<1x1x3x64xf32>
    %54 = vector.shape_cast %53 : vector<1x1x3x64xf32> to vector<3x64xf32>
    %cst_68 = arith.constant dense<0.000000e+00> : vector<256x64xf32>
    %55 = tpu.matmul %52, %54, %cst_68 {dimension_numbers = #tpu.dot_dimension_numbers<[1], [0], [0], [1], [0, 0, 1, 1], [], []>} : vector<256x3xf32>, vector<3x64xf32>, vector<256x64xf32> -> vector<256x64xf32>
    %56 = arith.addf %49, %55 : vector<256x64xf32>
    %c0_69 = arith.constant 0 : index
    %c2_70 = arith.constant 2 : index
    %c2_71 = arith.constant 2 : index
    %c0_72 = arith.constant 0 : index
    %57 = vector.load %arg1[%c0_69, %c2_70, %c2_71, %c0_72] : memref<1x18x18x3xf32, #tpu.memory_space<vmem>>, vector<1x16x16x3xf32>
    %58 = vector.shape_cast %57 : vector<1x16x16x3xf32> to vector<16x16x3xf32>
    %59 = vector.shape_cast %58 : vector<16x16x3xf32> to vector<256x3xf32>
    %c2_73 = arith.constant 2 : index
    %c2_74 = arith.constant 2 : index
    %c0_75 = arith.constant 0 : index
    %c0_76 = arith.constant 0 : index
    %60 = vector.load %arg2[%c2_73, %c2_74, %c0_75, %c0_76] : memref<3x3x3x64xf32, #tpu.memory_space<vmem>>, vector<1x1x3x64xf32>
    %61 = vector.shape_cast %60 : vector<1x1x3x64xf32> to vector<3x64xf32>
    %cst_77 = arith.constant dense<0.000000e+00> : vector<256x64xf32>
    %62 = tpu.matmul %59, %61, %cst_77 {dimension_numbers = #tpu.dot_dimension_numbers<[1], [0], [0], [1], [0, 0, 1, 1], [], []>} : vector<256x3xf32>, vector<3x64xf32>, vector<256x64xf32> -> vector<256x64xf32>
    %63 = arith.addf %56, %62 : vector<256x64xf32>
    %c0_78 = arith.constant 0 : index
    %c0_79 = arith.constant 0 : index
    %64 = vector.load %arg3[%c0_78, %c0_79] : memref<1x64xf32, #tpu.memory_space<vmem>>, vector<1x64xf32>
    %65 = vector.broadcast %64 : vector<1x64xf32> to vector<256x64xf32>
    %66 = arith.addf %63, %65 : vector<256x64xf32>
    %cst_80 = arith.constant 0.000000e+00 : f32
    %67 = vector.broadcast %cst_80 : f32 to vector<256x64xf32>
    %68 = arith.maximumf %66, %67 : vector<256x64xf32>
    %69 = vector.shape_cast %68 : vector<256x64xf32> to vector<16x16x64xf32>
    %c0_81 = arith.constant 0 : index
    %c0_82 = arith.constant 0 : index
    %c0_83 = arith.constant 0 : index
    %c0_84 = arith.constant 0 : index
    %70 = vector.load %arg4[%c0_81, %c0_82, %c0_83, %c0_84] : memref<1x16x16x64xf32, #tpu.memory_space<vmem>>, vector<1x16x16x64xf32>
    %71 = vector.shape_cast %70 : vector<1x16x16x64xf32> to vector<16x16x64xf32>
    %72 = vector.shape_cast %69 : vector<16x16x64xf32> to vector<1x16x16x64xf32>
    tpu.vector_store %arg4[%c0_81, %c0_82, %c0_83, %c0_84], %72 {strides = array<i32>} : memref<1x16x16x64xf32, #tpu.memory_space<vmem>>, vector<1x16x16x64xf32>,
    return
  }
  func.func @transform_0(%arg0: i32) -> (i32, i32, i32, i32) {
    %c0_i32 = arith.constant 0 : i32
    %c0_i32_0 = arith.constant 0 : i32
    %c0_i32_1 = arith.constant 0 : i32
    %c0_i32_2 = arith.constant 0 : i32
    return %arg0, %c0_i32, %c0_i32_0, %c0_i32_1 : i32, i32, i32, i32
  }
  func.func @transform_1(%arg0: i32) -> (i32, i32, i32, i32) {
    %c0_i32 = arith.constant 0 : i32
    %c0_i32_0 = arith.constant 0 : i32
    %c0_i32_1 = arith.constant 0 : i32
    %c0_i32_2 = arith.constant 0 : i32
    %c0_i32_3 = arith.constant 0 : i32
    return %c0_i32, %c0_i32_0, %c0_i32_1, %c0_i32_2 : i32, i32, i32, i32
  }
  func.func @transform_2(%arg0: i32) -> (i32, i32) {
    %c0_i32 = arith.constant 0 : i32
    %c0_i32_0 = arith.constant 0 : i32
    %c0_i32_1 = arith.constant 0 : i32
    return %c0_i32, %c0_i32_0 : i32, i32
  }
  func.func @transform_3(%arg0: i32) -> (i32, i32, i32, i32) {
    %c0_i32 = arith.constant 0 : i32
    %c0_i32_0 = arith.constant 0 : i32
    %c0_i32_1 = arith.constant 0 : i32
    %c0_i32_2 = arith.constant 0 : i32
    return %arg0, %c0_i32, %c0_i32_0, %c0_i32_1 : i32, i32, i32, i32
  }
}

</mosaic_0001>

<bundles_post_ra>
// kernel: tpu_custom_call.1
= control target key start
LH: loop header
LB: loop body
LE: loop exit
PB: predicated region body
PF: predicated region fallthrough
CT: control target
= control target key end

     0   :  { %8 = vsyncpa [#allocation3], 0  ;;  %s6592_s0 = inlined_call_operand.vmem [shape: f32[2,18,18,3], index: 0, kind: input, shape index: {}]   ;;  %s6593_s1 = inlined_call_operand.vmem [shape: f32[3,3,3,64], index: 1, kind: input, shape index: {}]   ;;  %s6594_s2 = inlined_call_operand.vmem [shape: f32[1,64], index: 2, kind: input, shape index: {}]   ;;  %s6595_s3 = inlined_call_operand.hbm [shape: f32[2,16,16,64], index: 3, kind: output, shape index: {}]  }
   0x1   :  { %10 = vsyncpa [#allocation3 + $0x1], 0  ;;  %s5442_s12 = smov 0   ;;  %s5444_s13 = smov 0  }
   0x2   :  { %s5446_s14 = smov 0   ;;  %s5448_s15 = smov 0  }
   0x3 LB: > { %s5463_s16 = sadd.s32 4294967295, %s5417_s15   ;;  %s3798_s17 = sadd.s32 4294967294, %s5417_s15   ;;  %s5417_s15 = sphi %s5448_s15, %s6710_s15   ;;  %s5413_s14 = sphi %s5446_s14, %s6709_s14   ;;  %s5409_s13 = sphi %s5444_s13, %s6708_s13   ;;  %s5405_s12 = sphi %s5442_s12, %s6707_s12  }
   0x4   : > { %s5467_s18 = sadd.s32 1, %s5417_s15   ;;  %s91_s19 = sadd.s32 1, %s5413_s14 }
   0x5   : > { %s88_s20 = ssub.s32 %s5417_s15, %s5467_s18  ;;  %p101_p0 = scmp.ne.s32.totalorder %s5413_s14, %s5409_s13 }
   0x6   : > { %p89_p1 = scmp.eq.s32.totalorder %s88_s20, 0  ;;  %p102_p2 = scmp.eq.s32.totalorder %s5463_s16, 1 }
   0x7   : > { %p107_p3 = scmp.ne.s32.totalorder %s5409_s13, %s5405_s12  ;;  %p108_p4 = scmp.eq.s32.totalorder %s3798_s17, 1 }
   0x8   : > { %s5478_s21 = scalar_select %p89_p1, %s5413_s14, %s91_s19  }
   0x9   : > { %p5480_p5 = por %p102_p2, %p101_p0  ;;  %p5484_p6 = por %p108_p4, %p107_p3 }
   0xa   : > { %p3801_p7 = scmp.ge.s32.totalorder %s5417_s15, 1  ;;  %p140_p8 = scmp.lt.s32.totalorder %s5417_s15, 3 }
   0xc   : > { %p141_p9 = pnand %p3801_p7, %p140_p8 }
   0xe   : > { %144 = sbr.rel (%p141_p9) target bundleno = 548 (0x224), region = 32 }
  0x15   : > { %v3804_v0 = vld [vmem:[%s6593_s1 + $0x4] sm:$0x7]  ;;  %vm333_vm0 = vcmask 1042432   ;;  %v5496_v1 = vld [vmem:[%s6593_s1 + $0x10] sm:$0x7]  ;;  %p164_p10 = scmp.lt.s32.totalorder %s5463_s16, 1 }
  0x16   : > { %4605 = vmatprep.subr.msk.mxu1 %vm333_vm0, %v3804_v0  ;;  %4805 = vmatprep.subr.msk.mxu0 %vm333_vm0, %v5496_v1  ;;  %v201_v2 = vld [vmem:[%s6593_s1] sm:$0x7]  ;;  %v4069_v3 = vld [vmem:[%s6593_s1 + $0x14] sm:$0x7]  ;;  %vm236_vm1 = vcmask 23552   ;;  %s161_s29 = sand.u32 1, %s5409_s13  }
  0x17   : > { %4606 = vmatpush3.msk.msra.mxu1 %vm333_vm0, %v3804_v0  ;;  %4806 = vmatpush3.msk.msra.mxu0 %vm333_vm0, %v5496_v1  ;;  %s165_s5 = scalar_select %p164_p10, %s5463_s16, 1  ;;  %v4135_v9 = vld [vmem:[%s6593_s1 + $0x18] sm:$0x7]  ;;  %v5536_v10 = vld [vmem:[%s6593_s1 + $0x8] sm:$0x7]  ;;  %vm3689_vm2 = vcmask 523264  }
  0x18   : > { %4655 = vmatprep.subr.msk.mxu1 %vm333_vm0, %v201_v2  ;;  %4855 = vmatprep.subr.msk.mxu0 %vm333_vm0, %v4069_v3  ;;  %v5655_v28 = vld [vmem:[%s6593_s1 + $0x1c] sm:$0x7]  ;;  %v5818_v61 = vld [vmem:[%s6593_s1 + $0xc] sm:$0x7]  ;;  %s4307_s7 = sshll.u32 %s5463_s16, 12  ;;  %s6551_s16 = scalar_lea.sflag [#allocation3], %s161_s29 }
  0x19   : > { %s5313_s6 = smul.u32 432, %s165_s5  ;;  %s3802_s5 = sshll.u32 %s161_s29, 8 }
  0x1a   : > { %s6541_s11 = scalar_lea.hbm %s6595_s3, %s4307_s7  ;;  %s5419_s19 = smov [#allocation2]  }
  0x1b   : > { %s5517_s9 = scalar_lea.vmem %s6592_s0, %s5313_s6  ;;  %s6440_s6 = scalar_lea.vmem [#allocation2], %s3802_s5 }
  0x1c   : > { %v202_v4 = vld [vmem:[%s5517_s9 + $0x1] sm:$0xff]  ;;  %v3971_v5 = vld [vmem:[%s5517_s9 + $0x19] sm:$0xff]  ;;  %v203_v6 = vld [vmem:[%s5517_s9 + $0x9] sm:$0xff]  ;;  %s3736_s8 = sshll.u32 %s6440_s6, 4  ;;  %s5359_s20 = sshll.u32 %s5419_s19, 4  ;;  %s6543_s8 = int_to_ptr.vmem [resolvable:$true] %s3736_s8  ;;  %s5360_s20 = int_to_ptr.vmem [resolvable:$false] %s5359_s20 }
  0x1d   : > { %4607 = vmatprep.mubr.msk.f32.mxu1 %vm236_vm1, %v202_v4  ;;  %4807 = vmatprep.mubr.msk.f32.mxu0 %vm236_vm1, %v3971_v5  ;;  %v3972_v7 = vld [vmem:[%s5517_s9 + $0x21] sm:$0xff]  ;;  %v5526_v8 = vld [vmem:[%s5517_s9 + $0x31] sm:$0xff]  ;;  %v5541_v11 = vld [vmem:[%s5517_s9 + $0x39] sm:$0xff]  ;;  %s5355_s17 = scalar_lea.vmem %s6543_s8, 4096  ;;  %s5361_s24 = scalar_lea.vmem %s5360_s20, 8192 }
  0x1e   : > { %4608 = vmatmul.mubr.msk.f32.vlgmr.msra.gmra.mrb[0].mxu1 %vm236_vm1, %v203_v6  ;;  %4808 = vmatmul.mubr.msk.f32.vlgmr.msra.gmra.mrb[0].mxu0 %vm236_vm1, %v3972_v7  ;;  %v5547_v12 = vld [vmem:[%s5517_s9 + $0x49] sm:$0xff]  ;;  %v5560_v13 = vld [vmem:[%s5517_s9 + $0x51] sm:$0xff]  ;;  %v5563_v14 = vld [vmem:[%s5517_s9 + $0x61] sm:$0xff]  ;;  %p5356_p11 = scmp.ne.s32.totalorder %s6543_s8, %s5355_s17  ;;  %p5362_p0 = scmp.lt.s32.totalorder %s6543_s8, %s5360_s20 }
  0x1f   : > { %4656 = vmatpush3.msk.msra.mxu1 %vm333_vm0, %v201_v2  ;;  %4856 = vmatpush3.msk.msra.mxu0 %vm333_vm0, %v4069_v3  ;;  %v5574_v15 = vld [vmem:[%s5517_s9 + $0x69] sm:$0xff]  ;;  %v5577_v16 = vld [vmem:[%s5517_s9 + $0x79] sm:$0xff]  ;;  %v5588_v17 = vld [vmem:[%s5517_s9 + $0x81] sm:$0xff]  ;;  %p5363_p1 = scmp.lt.s32.totalorder %s5361_s24, %s5355_s17 }
  0x20   : > { %4610 = vmatprep.mubr.msk.f32.mxu1 %vm236_vm1, %v3971_v5  ;;  %4810 = vmatprep.mubr.msk.f32.mxu0 %vm236_vm1, %v5526_v8  ;;  %v5591_v18 = vld [vmem:[%s5517_s9 + $0x91] sm:$0xff]  ;;  %v5602_v19 = vld [vmem:[%s5517_s9 + $0x99] sm:$0xff]  ;;  %v5605_v20 = vld [vmem:[%s5517_s9 + $0xa9] sm:$0xff]  ;;  %p5357_p12 = pnand %p5356_p11, %p5480_p5 }
  0x21   : > { %4905 = vmatprep.subr.msk.mxu0 %vm333_vm0, %v4135_v9  ;;  %4705 = vmatprep.subr.msk.mxu1 %vm333_vm0, %v5536_v10  ;;  %v5616_v21 = vld [vmem:[%s5517_s9 + $0xb1] sm:$0xff]  ;;  %v5619_v22 = vld [vmem:[%s5517_s9 + $0xc1] sm:$0xff]  ;;  %v5630_v23 = vld [vmem:[%s5517_s9 + $0xc9] sm:$0xff]  ;;  %p5364_p2 = por %p5363_p1, %p5362_p0 }
  0x22   : > { %4611 = vmatmul.mubr.msk.f32.gmra.mrb[2].mxu1 %vm236_vm1, %v3972_v7  ;;  %4811 = vmatmul.mubr.msk.f32.gmra.mrb[2].mxu0 %vm236_vm1, %v5541_v11  ;;  %v5633_v24 = vld [vmem:[%s5517_s9 + $0x1a] sm:$0xff]  ;;  %v5644_v25 = vld [vmem:[%s5517_s9 + $0x22] sm:$0xff]  ;;  %v5650_v27 = vld [vmem:[%s5517_s9 + $0x32] sm:$0xff]  ;;  %p5358_p13 = pneg %p5357_p12 }
  0x23   : > { %4613 = vmatprep.mubr.msk.f32.mxu1 %vm236_vm1, %v5526_v8  ;;  %4813 = vmatprep.mubr.msk.f32.mxu0 %vm236_vm1, %v5547_v12  ;;  %v5647_v26 = vld [vmem:[%s5517_s9 + $0xd9] sm:$0xff]  ;;  %v5665_v29 = vld [vmem:[%s5517_s9 + $0xe1] sm:$0xff]  ;;  %v5673_v31 = vld [vmem:[%s5517_s9 + $0xf1] sm:$0xff] }
  0x24   : > { %6643 = vst [vmem:[#allocation5_spill] sm:$0xff] %v5665_v29  ;;  %v5668_v30 = vld [vmem:[%s5517_s9 + $0x3a] sm:$0xff]  ;;  %6644 = vst [vmem:[#allocation6_spill] sm:$0xff] %v5673_v31  ;;  %v5676_v32 = vld [vmem:[%s5517_s9 + $0x4a] sm:$0xff]  ;;  %p5365_p3 = pnand %p5364_p2, %p5358_p13 }
  0x25   : > { %v5689_v33 = vld [vmem:[%s5517_s9 + $0xf9] sm:$0xff]  ;;  %v5695_v35 = vld [vmem:[%s5517_s9 + $0x109] sm:$0xff]  ;;  %v5709_v37 = vld [vmem:[%s5517_s9 + $0x111] sm:$0xff] }
  0x26   : > { %4614 = vmatmul.mubr.msk.f32.gmra.mrb[4].mxu1 %vm236_vm1, %v5541_v11  ;;  %4814 = vmatmul.mubr.msk.f32.gmra.mrb[4].mxu0 %vm236_vm1, %v5560_v13  ;;  %6645 = vst [vmem:[#allocation7_spill] sm:$0xff] %v5689_v33  ;;  %v5692_v34 = vld [vmem:[%s5517_s9 + $0x52] sm:$0xff]  ;;  %6646 = vst [vmem:[#allocation8_spill] sm:$0xff] %v5695_v35  ;;  %v5698_v36 = vld [vmem:[%s5517_s9 + $0x62] sm:$0xff] }
  0x27   : > { %4616 = vmatprep.mubr.msk.f32.mxu1 %vm236_vm1, %v5547_v12  ;;  %4816 = vmatprep.mubr.msk.f32.mxu0 %vm236_vm1, %v5563_v14  ;;  %6647 = vst [vmem:[#allocation9_spill] sm:$0xff] %v5709_v37  ;;  %v5712_v38 = vld [vmem:[%s5517_s9 + $0x6a] sm:$0xff]  ;;  %v5715_v39 = vld [vmem:[%s5517_s9 + $0x121] sm:$0xff]  ;;  %v5735_v43 = vld [vmem:[%s5517_s9 + $0x139] sm:$0xff] }
  0x28   : > { %6648 = vst [vmem:[#allocation10_spill] sm:$0xff] %v5715_v39  ;;  %v5718_v40 = vld [vmem:[%s5517_s9 + $0x7a] sm:$0xff]  ;;  %v5729_v41 = vld [vmem:[%s5517_s9 + $0x129] sm:$0xff]  ;;  %6650 = vst [vmem:[#allocation12_spill] sm:$0xff] %v5735_v43 }
  0x29   : > { %6649 = vst [vmem:[#allocation11_spill] sm:$0xff] %v5729_v41  ;;  %v5732_v42 = vld [vmem:[%s5517_s9 + $0x82] sm:$0xff]  ;;  %v5738_v44 = vld [vmem:[%s5517_s9 + $0x92] sm:$0xff]  ;;  %v5752_v46 = vld [vmem:[%s5517_s9 + $0x9a] sm:$0xff] }
  0x2a   : > { %4617 = vmatmul.mubr.msk.f32.gmra.mrb[6].mxu1 %vm236_vm1, %v5560_v13  ;;  %4817 = vmatmul.mubr.msk.f32.gmra.mrb[6].mxu0 %vm236_vm1, %v5574_v15  ;;  %v5749_v45 = vld [vmem:[%s5517_s9 + $0x141] sm:$0xff]  ;;  %v5755_v47 = vld [vmem:[%s5517_s9 + $0x151] sm:$0xff]  ;;  %v5769_v49 = vld [vmem:[%s5517_s9 + $0x159] sm:$0xff] }
  0x2b   : > { %4619 = vmatprep.mubr.msk.f32.mxu1 %vm236_vm1, %v5563_v14  ;;  %4819 = vmatprep.mubr.msk.f32.mxu0 %vm236_vm1, %v5577_v16  ;;  %6651 = vst [vmem:[#allocation13_spill] sm:$0xff] %v5749_v45  ;;  %6652 = vst [vmem:[#allocation14_spill] sm:$0xff] %v5755_v47  ;;  %v5758_v48 = vld [vmem:[%s5517_s9 + $0xaa] sm:$0xff]  ;;  %v5772_v50 = vld [vmem:[%s5517_s9 + $0xb2] sm:$0xff] }
  0x2c   : > { %6653 = vst [vmem:[#allocation15_spill] sm:$0xff] %v5769_v49  ;;  %v5775_v51 = vld [vmem:[%s5517_s9 + $0x169] sm:$0xff]  ;;  %v5789_v53 = vld [vmem:[%s5517_s9 + $0x171] sm:$0xff]  ;;  %v169_v55 = vld [vmem:[%s5517_s9] sm:$0xff] }
  0x2d   : > { %6654 = vst [vmem:[#allocation16_spill] sm:$0xff] %v5775_v51  ;;  %v5778_v52 = vld [vmem:[%s5517_s9 + $0xc2] sm:$0xff]  ;;  %6655 = vst [vmem:[#allocation17_spill] sm:$0xff] %v5789_v53  ;;  %v5792_v54 = vld [vmem:[%s5517_s9 + $0xca] sm:$0xff] }
  0x2e   : > { %4620 = vmatmul.mubr.msk.f32.gmra.mrb[8].mxu1 %vm236_vm1, %v5574_v15  ;;  %4820 = vmatmul.mubr.msk.f32.gmra.mrb[8].mxu0 %vm236_vm1, %v5588_v17  ;;  %v5796_v56 = vld [vmem:[%s5517_s9 + $0xda] sm:$0xff]  ;;  %v170_v57 = vld [vmem:[%s5517_s9 + $0x8] sm:$0xff]  ;;  %v5813_v60 = vld [vmem:[%s5517_s9 + $0xf2] sm:$0xff] }
  0x2f   : > { %4622 = vmatprep.mubr.msk.f32.mxu1 %vm236_vm1, %v5577_v16  ;;  %4822 = vmatprep.mubr.msk.f32.mxu0 %vm236_vm1, %v5591_v18  ;;  %v5807_v58 = vld [vmem:[%s5517_s9 + $0xe2] sm:$0xff]  ;;  %v5810_v59 = vld [vmem:[%s5517_s9 + $0x18] sm:$0xff]  ;;  %v5836_v0 = vld [vmem:[%s5517_s9 + $0x30] sm:$0xff] }
  0x30   : > { %6656 = vst [vmem:[#allocation18_spill] sm:$0xff] %v5810_v59  ;;  %v5828_v62 = vld [vmem:[%s5517_s9 + $0x20] sm:$0xff]  ;;  %6658 = vst [vmem:[#allocation20_spill] sm:$0xff] %v5836_v0  ;;  %v5839_v2 = vld [vmem:[%s5517_s9 + $0x10a] sm:$0xff] }
  0x31   : > { %6657 = vst [vmem:[#allocation19_spill] sm:$0xff] %v5828_v62  ;;  %v5831_v63 = vld [vmem:[%s5517_s9 + $0xfa] sm:$0xff]  ;;  %v5855_v4 = vld [vmem:[%s5517_s9 + $0x112] sm:$0xff]  ;;  %v5858_v5 = vld [vmem:[%s5517_s9 + $0x48] sm:$0xff] }
  0x32   : > { %4623 = vmatmul.mubr.msk.f32.gmra.mrb[10].mxu1 %vm236_vm1, %v5588_v17  ;;  %4823 = vmatmul.mubr.msk.f32.gmra.mrb[10].mxu0 %vm236_vm1, %v5602_v19  ;;  %v5852_v3 = vld [vmem:[%s5517_s9 + $0x38] sm:$0xff]  ;;  %6660 = vst [vmem:[#allocation22_spill] sm:$0xff] %v5858_v5  ;;  %v5861_v6 = vld [vmem:[%s5517_s9 + $0x122] sm:$0xff]  ;;  %v5872_v7 = vld [vmem:[%s5517_s9 + $0x50] sm:$0xff] }
  0x33   : > { %4625 = vmatprep.mubr.msk.f32.mxu1 %vm236_vm1, %v5591_v18  ;;  %4825 = vmatprep.mubr.msk.f32.mxu0 %vm236_vm1, %v5605_v20  ;;  %6659 = vst [vmem:[#allocation21_spill] sm:$0xff] %v5852_v3  ;;  %6661 = vst [vmem:[#allocation23_spill] sm:$0xff] %v5872_v7 }
  0x36   : > { %4626 = vmatmul.mubr.msk.f32.gmra.mrb[12].mxu1 %vm236_vm1, %v5602_v19  ;;  %4826 = vmatmul.mubr.msk.f32.gmra.mrb[12].mxu0 %vm236_vm1, %v5616_v21 }
  0x37   : > { %4628 = vmatprep.mubr.msk.f32.mxu1 %vm236_vm1, %v5605_v20  ;;  %4828 = vmatprep.mubr.msk.f32.mxu0 %vm236_vm1, %v5619_v22 }
  0x3a   : > { %4629 = vmatmul.mubr.msk.f32.gmra.mrb[14].mxu1 %vm236_vm1, %v5616_v21  ;;  %4829 = vmatmul.mubr.msk.f32.gmra.mrb[14].mxu0 %vm236_vm1, %v5630_v23 }
  0x3b   : > { %4631 = vmatprep.mubr.msk.f32.mxu1 %vm236_vm1, %v5619_v22  ;;  %4857 = vmatprep.mubr.msk.f32.mxu0 %vm236_vm1, %v5633_v24 }
  0x3e   : > { %4632 = vmatmul.mubr.msk.f32.gmra.mrb[16].mxu1 %vm236_vm1, %v5630_v23  ;;  %4858 = vmatmul.mubr.msk.f32.vlgmr.msra.gmra.mrb[0].mxu0 %vm236_vm1, %v5644_v25 }
  0x3f   : > { %4906 = vmatpush3.msk.msra.mxu0 %vm333_vm0, %v4135_v9  ;;  %4634 = vmatprep.mubr.msk.f32.mxu1 %vm236_vm1, %v5647_v26  ;;  %v5875_v9 = vld [vmem:[%s5517_s9 + $0x12a] sm:$0xff] }
  0x40   : > { %4860 = vmatprep.mubr.msk.f32.mxu0 %vm236_vm1, %v5650_v27  ;;  %4955 = vmatprep.subr.msk.mxu0 %vm333_vm0, %v5655_v28 }
  0x42   : > { %4635 = vmatmul.mubr.msk.f32.gmra.mrb[18].mxu1 %vm236_vm1, %v5665_v29  ;;  %4861 = vmatmul.mubr.msk.f32.gmra.mrb[2].mxu0 %vm236_vm1, %v5668_v30  ;;  %v5972_v29 = vld [vmem:[%s5517_s9 + $0xd8] sm:$0xff] }
  0x43   : > { %4637 = vmatprep.mubr.msk.f32.mxu1 %vm236_vm1, %v5673_v31  ;;  %4863 = vmatprep.mubr.msk.f32.mxu0 %vm236_vm1, %v5676_v32  ;;  %v5955_v31 = vld [vmem:[%s5517_s9 + $0x18a] sm:$0xff] }
  0x44   : > { %6672 = vst [vmem:[#allocation34_spill] sm:$0xff] %v5955_v31 }
  0x46   : > { %4638 = vmatmul.mubr.msk.f32.gmra.mrb[20].mxu1 %vm236_vm1, %v5689_v33  ;;  %4864 = vmatmul.mubr.msk.f32.gmra.mrb[4].mxu0 %vm236_vm1, %v5692_v34  ;;  %v5941_v33 = vld [vmem:[%s5517_s9 + $0x182] sm:$0xff] }
  0x47   : > { %4640 = vmatprep.mubr.msk.f32.mxu1 %vm236_vm1, %v5695_v35  ;;  %4866 = vmatprep.mubr.msk.f32.mxu0 %vm236_vm1, %v5698_v36  ;;  %v5938_v35 = vld [vmem:[%s5517_s9 + $0xa8] sm:$0xff]  ;;  %6670 = vst [vmem:[#allocation32_spill] sm:$0xff] %v5941_v33 }
  0x48   : > { %6669 = vst [vmem:[#allocation31_spill] sm:$0xff] %v5938_v35 }
  0x4a   : > { %4641 = vmatmul.mubr.msk.f32.gmra.mrb[22].mxu1 %vm236_vm1, %v5709_v37  ;;  %4867 = vmatmul.mubr.msk.f32.gmra.mrb[6].mxu0 %vm236_vm1, %v5712_v38  ;;  %v5935_v37 = vld [vmem:[%s5517_s9 + $0x172] sm:$0xff] }
  0x4b   : > { %4643 = vmatprep.mubr.msk.f32.mxu1 %vm236_vm1, %v5715_v39  ;;  %4869 = vmatprep.mubr.msk.f32.mxu0 %vm236_vm1, %v5718_v40  ;;  %v5932_v39 = vld [vmem:[%s5517_s9 + $0x98] sm:$0xff]  ;;  %6668 = vst [vmem:[#allocation30_spill] sm:$0xff] %v5935_v37 }
  0x4c   : > { %6667 = vst [vmem:[#allocation29_spill] sm:$0xff] %v5932_v39 }
  0x4e   : > { %4644 = vmatmul.mubr.msk.f32.gmra.mrb[24].mxu1 %vm236_vm1, %v5729_v41  ;;  %4870 = vmatmul.mubr.msk.f32.gmra.mrb[8].mxu0 %vm236_vm1, %v5732_v42  ;;  %v5921_v41 = vld [vmem:[%s5517_s9 + $0x16a] sm:$0xff] }
  0x4f   : > { %4646 = vmatprep.mubr.msk.f32.mxu1 %vm236_vm1, %v5735_v43  ;;  %4872 = vmatprep.mubr.msk.f32.mxu0 %vm236_vm1, %v5738_v44  ;;  %v5918_v43 = vld [vmem:[%s5517_s9 + $0x90] sm:$0xff] }
  0x50   : > { %6666 = vst [vmem:[#allocation28_spill] sm:$0xff] %v5918_v43 }
  0x52   : > { %4647 = vmatmul.mubr.msk.f32.gmra.mrb[26].mxu1 %vm236_vm1, %v5749_v45  ;;  %4873 = vmatmul.mubr.msk.f32.gmra.mrb[10].mxu0 %vm236_vm1, %v5752_v46  ;;  %v5915_v45 = vld [vmem:[%s5517_s9 + $0x15a] sm:$0xff] }
  0x53   : > { %4649 = vmatprep.mubr.msk.f32.mxu1 %vm236_vm1, %v5755_v47  ;;  %4875 = vmatprep.mubr.msk.f32.mxu0 %vm236_vm1, %v5758_v48  ;;  %v5912_v47 = vld [vmem:[%s5517_s9 + $0x80] sm:$0xff] }
  0x54   : > { %6665 = vst [vmem:[#allocation27_spill] sm:$0xff] %v5912_v47 }
  0x56   : > { %4650 = vmatmul.mubr.msk.f32.gmra.mrb[28].mxu1 %vm236_vm1, %v5769_v49  ;;  %4876 = vmatmul.mubr.msk.f32.gmra.mrb[12].mxu0 %vm236_vm1, %v5772_v50  ;;  %v5901_v49 = vld [vmem:[%s5517_s9 + $0x152] sm:$0xff] }
  0x57   : > { %4652 = vmatprep.mubr.msk.f32.mxu1 %vm236_vm1, %v5775_v51  ;;  %4878 = vmatprep.mubr.msk.f32.mxu0 %vm236_vm1, %v5778_v52  ;;  %v5898_v51 = vld [vmem:[%s5517_s9 + $0x78] sm:$0xff] }
  0x58   : > { %6664 = vst [vmem:[#allocation26_spill] sm:$0xff] %v5898_v51 }
  0x5a   : > { %4653 = vmatmul.mubr.msk.f32.gmra.mrb[30].mxu1 %vm236_vm1, %v5789_v53  ;;  %4879 = vmatmul.mubr.msk.f32.gmra.mrb[14].mxu0 %vm236_vm1, %v5792_v54  ;;  %v5895_v53 = vld [vmem:[%s5517_s9 + $0x142] sm:$0xff] }
  0x5b   : > { %4657 = vmatprep.mubr.msk.f32.mxu1 %vm236_vm1, %v169_v55  ;;  %4881 = vmatprep.mubr.msk.f32.mxu0 %vm236_vm1, %v5796_v56  ;;  %v5881_v55 = vld [vmem:[%s5517_s9 + $0x13a] sm:$0xff] }
  0x5e   : > { %4658 = vmatmul.mubr.msk.f32.vlgmr.msra.gmra.mrb[0].mxu1 %vm236_vm1, %v170_v57  ;;  %4882 = vmatmul.mubr.msk.f32.gmra.mrb[16].mxu0 %vm236_vm1, %v5807_v58  ;;  %v5892_v57 = vld [vmem:[%s5517_s9 + $0x68] sm:$0xff] }
  0x5f   : > { %4706 = vmatpush3.msk.msra.mxu1 %vm333_vm0, %v5536_v10  ;;  %4660 = vmatprep.mubr.msk.f32.mxu1 %vm236_vm1, %v5810_v59  ;;  %v5878_v10 = vld [vmem:[%s5517_s9 + $0x60] sm:$0xff]  ;;  %6663 = vst [vmem:[#allocation25_spill] sm:$0xff] %v5892_v57 }
  0x60   : > { %4884 = vmatprep.mubr.msk.f32.mxu0 %vm236_vm1, %v5813_v60  ;;  %4755 = vmatprep.subr.msk.mxu1 %vm333_vm0, %v5818_v61  ;;  %6662 = vst [vmem:[#allocation24_spill] sm:$0xff] %v5878_v10  ;;  %v5958_v59 = vld [vmem:[%s5517_s9 + $0xc0] sm:$0xff] }
  0x62   : > { %4661 = vmatmul.mubr.msk.f32.gmra.mrb[2].mxu1 %vm236_vm1, %v5828_v62  ;;  %4885 = vmatmul.mubr.msk.f32.gmra.mrb[18].mxu0 %vm236_vm1, %v5831_v63  ;;  %v5952_v62 = vld [vmem:[%s5517_s9 + $0xb0] sm:$0xff] }
  0x63   : > { %4663 = vmatprep.mubr.msk.f32.mxu1 %vm236_vm1, %v5836_v0  ;;  %4887 = vmatprep.mubr.msk.f32.mxu0 %vm236_vm1, %v5839_v2  ;;  %6671 = vst [vmem:[#allocation33_spill] sm:$0xff] %v5952_v62 }
  0x66   : > { %4664 = vmatmul.mubr.msk.f32.gmra.mrb[4].mxu1 %vm236_vm1, %v5852_v3  ;;  %4888 = vmatmul.mubr.msk.f32.gmra.mrb[20].mxu0 %vm236_vm1, %v5855_v4 }
  0x67   : > { %4666 = vmatprep.mubr.msk.f32.mxu1 %vm236_vm1, %v5858_v5  ;;  %4890 = vmatprep.mubr.msk.f32.mxu0 %vm236_vm1, %v5861_v6 }
  0x6a   : > { %4667 = vmatmul.mubr.msk.f32.gmra.mrb[6].mxu1 %vm236_vm1, %v5872_v7  ;;  %4891 = vmatmul.mubr.msk.f32.gmra.mrb[22].mxu0 %vm236_vm1, %v5875_v9 }
  0x6b   : > { %4669 = vmatprep.mubr.msk.f32.mxu1 %vm236_vm1, %v5878_v10  ;;  %4893 = vmatprep.mubr.msk.f32.mxu0 %vm236_vm1, %v5881_v55 }
  0x6e   : > { %4670 = vmatmul.mubr.msk.f32.gmra.mrb[8].mxu1 %vm236_vm1, %v5892_v57  ;;  %4894 = vmatmul.mubr.msk.f32.gmra.mrb[24].mxu0 %vm236_vm1, %v5895_v53 }
  0x6f   : > { %4672 = vmatprep.mubr.msk.f32.mxu1 %vm236_vm1, %v5898_v51  ;;  %4896 = vmatprep.mubr.msk.f32.mxu0 %vm236_vm1, %v5901_v49 }
  0x72   : > { %4673 = vmatmul.mubr.msk.f32.gmra.mrb[10].mxu1 %vm236_vm1, %v5912_v47  ;;  %4897 = vmatmul.mubr.msk.f32.gmra.mrb[26].mxu0 %vm236_vm1, %v5915_v45 }
  0x73   : > { %4675 = vmatprep.mubr.msk.f32.mxu1 %vm236_vm1, %v5918_v43  ;;  %4899 = vmatprep.mubr.msk.f32.mxu0 %vm236_vm1, %v5921_v41 }
  0x76   : > { %4676 = vmatmul.mubr.msk.f32.gmra.mrb[12].mxu1 %vm236_vm1, %v5932_v39  ;;  %4900 = vmatmul.mubr.msk.f32.gmra.mrb[28].mxu0 %vm236_vm1, %v5935_v37  ;;  %v5977_v37 = vld [vmem:[%s6593_s1 + $0x20] sm:$0x7] }
  0x77   : > { %4678 = vmatprep.mubr.msk.f32.mxu1 %vm236_vm1, %v5938_v35  ;;  %4902 = vmatprep.mubr.msk.f32.mxu0 %vm236_vm1, %v5941_v33  ;;  %v5969_v33 = vld [vmem:[%s5517_s9 + $0xc8] sm:$0xff] }
  0x78   : > { %6673 = vst [vmem:[#allocation35_spill] sm:$0xff] %v5969_v33 }
  0x7a   : > { %4679 = vmatmul.mubr.msk.f32.gmra.mrb[14].mxu1 %vm236_vm1, %v5952_v62  ;;  %4903 = vmatmul.mubr.msk.f32.gmra.mrb[30].mxu0 %vm236_vm1, %v5955_v31  ;;  %v5988_v31 = vld [vmem:[%s5517_s9 + $0xe0] sm:$0xff] }
  0x7b   : > { %4681 = vmatprep.mubr.msk.f32.mxu1 %vm236_vm1, %v5958_v59  ;;  %4907 = vmatprep.mubr.msk.f32.mxu0 %vm236_vm1, %v5836_v0  ;;  %v5993_v0 = vld [vmem:[%s5517_s9 + $0xf0] sm:$0xff] }
  0x7e   : > { %4682 = vmatmul.mubr.msk.f32.gmra.mrb[16].mxu1 %vm236_vm1, %v5969_v33  ;;  %4908 = vmatmul.mubr.msk.f32.vlgmr.msra.gmra.mrb[0].mxu0 %vm236_vm1, %v5852_v3  ;;  %v886_v3 = vld [vmem:[%s5517_s9 + $0x2] sm:$0xff] }
  0x7f   : > { %4956 = vmatpush3.msk.msra.mxu0 %vm333_vm0, %v5655_v28  ;;  %4684 = vmatprep.mubr.msk.f32.mxu1 %vm236_vm1, %v5972_v29  ;;  %v6006_v28 = vld [vmem:[%s5517_s9 + $0xf8] sm:$0xff] }
  0x80   : > { %4910 = vmatprep.mubr.msk.f32.mxu0 %vm236_vm1, %v5858_v5  ;;  %5005 = vmatprep.subr.msk.mxu0 %vm333_vm0, %v5977_v37  ;;  %v6009_v5 = vld [vmem:[%s5517_s9 + $0x108] sm:$0xff] }
  0x82   : > { %4685 = vmatmul.mubr.msk.f32.gmra.mrb[18].mxu1 %vm236_vm1, %v5988_v31  ;;  %4911 = vmatmul.mubr.msk.f32.gmra.mrb[2].mxu0 %vm236_vm1, %v5872_v7  ;;  %v6020_v7 = vld [vmem:[%s5517_s9 + $0x110] sm:$0xff] }
  0x83   : > { %4687 = vmatprep.mubr.msk.f32.mxu1 %vm236_vm1, %v5993_v0  ;;  %4913 = vmatprep.mubr.msk.f32.mxu0 %vm236_vm1, %v5878_v10  ;;  %v6023_v10 = vld [vmem:[%s5517_s9 + $0x120] sm:$0xff] }
  0x86   : > { %4688 = vmatmul.mubr.msk.f32.gmra.mrb[20].mxu1 %vm236_vm1, %v6006_v28  ;;  %4914 = vmatmul.mubr.msk.f32.gmra.mrb[4].mxu0 %vm236_vm1, %v5892_v57  ;;  %v6034_v57 = vld [vmem:[%s5517_s9 + $0x128] sm:$0xff] }
  0x87   : > { %4690 = vmatprep.mubr.msk.f32.mxu1 %vm236_vm1, %v6009_v5  ;;  %4916 = vmatprep.mubr.msk.f32.mxu0 %vm236_vm1, %v5898_v51  ;;  %v6037_v51 = vld [vmem:[%s5517_s9 + $0x138] sm:$0xff] }
  0x8a   : > { %4691 = vmatmul.mubr.msk.f32.gmra.mrb[22].mxu1 %vm236_vm1, %v6020_v7  ;;  %4917 = vmatmul.mubr.msk.f32.gmra.mrb[6].mxu0 %vm236_vm1, %v5912_v47  ;;  %v6048_v47 = vld [vmem:[%s5517_s9 + $0x140] sm:$0xff] }
  0x8b   : > { %4693 = vmatprep.mubr.msk.f32.mxu1 %vm236_vm1, %v6023_v10  ;;  %4919 = vmatprep.mubr.msk.f32.mxu0 %vm236_vm1, %v5918_v43  ;;  %v6051_v43 = vld [vmem:[%s5517_s9 + $0x150] sm:$0xff] }
  0x8e   : > { %4694 = vmatmul.mubr.msk.f32.gmra.mrb[24].mxu1 %vm236_vm1, %v6034_v57  ;;  %4920 = vmatmul.mubr.msk.f32.gmra.mrb[8].mxu0 %vm236_vm1, %v5932_v39  ;;  %v6062_v39 = vld [vmem:[%s5517_s9 + $0x158] sm:$0xff] }
  0x8f   : > { %4696 = vmatprep.mubr.msk.f32.mxu1 %vm236_vm1, %v6037_v51  ;;  %4922 = vmatprep.mubr.msk.f32.mxu0 %vm236_vm1, %v5938_v35  ;;  %v6065_v35 = vld [vmem:[%s5517_s9 + $0x168] sm:$0xff] }
  0x92   : > { %4697 = vmatmul.mubr.msk.f32.gmra.mrb[26].mxu1 %vm236_vm1, %v6048_v47  ;;  %4923 = vmatmul.mubr.msk.f32.gmra.mrb[10].mxu0 %vm236_vm1, %v5952_v62  ;;  %v6076_v62 = vld [vmem:[%s5517_s9 + $0x170] sm:$0xff] }
  0x93   : > { %4699 = vmatprep.mubr.msk.f32.mxu1 %vm236_vm1, %v6051_v43  ;;  %4925 = vmatprep.mubr.msk.f32.mxu0 %vm236_vm1, %v5958_v59 }
  0x96   : > { %4700 = vmatmul.mubr.msk.f32.gmra.mrb[28].mxu1 %vm236_vm1, %v6062_v39  ;;  %4926 = vmatmul.mubr.msk.f32.gmra.mrb[12].mxu0 %vm236_vm1, %v5969_v33  ;;  %v887_v33 = vld [vmem:[%s5517_s9 + $0xa] sm:$0xff] }
  0x97   : > { %4702 = vmatprep.mubr.msk.f32.mxu1 %vm236_vm1, %v6065_v35  ;;  %4928 = vmatprep.mubr.msk.f32.mxu0 %vm236_vm1, %v5972_v29 }
  0x9a   : > { %4703 = vmatmul.mubr.msk.f32.gmra.mrb[30].mxu1 %vm236_vm1, %v6076_v62  ;;  %4929 = vmatmul.mubr.msk.f32.gmra.mrb[14].mxu0 %vm236_vm1, %v5988_v31 }
  0x9b   : > { %4707 = vmatprep.mubr.msk.f32.mxu1 %vm236_vm1, %v886_v3  ;;  %4931 = vmatprep.mubr.msk.f32.mxu0 %vm236_vm1, %v5993_v0  ;;  %v6690_v3 = vld [vmem:[#allocation25_spill] sm:$0xff] }
  0x9e   : > { %4708 = vmatmul.mubr.msk.f32.vlgmr.msra.gmra.mrb[0].mxu1 %vm236_vm1, %v887_v33  ;;  %4932 = vmatmul.mubr.msk.f32.gmra.mrb[16].mxu0 %vm236_vm1, %v6006_v28  ;;  %v4133_v33 = vld [vmem:[%s5517_s9 + $0x198] sm:$0xff] }
  0x9f   : > { %4756 = vmatpush3.msk.msra.mxu1 %vm333_vm0, %v5818_v61  ;;  %4710 = vmatprep.mubr.msk.f32.mxu1 %vm236_vm1, %v5633_v24  ;;  %v6131_v24 = vld [vmem:[%s5517_s9 + $0x180] sm:$0xff] }
  0xa0   : > { %4934 = vmatprep.mubr.msk.f32.mxu0 %vm236_vm1, %v6009_v5  ;;  %5055 = vmatprep.subr.msk.mxu1 %vm333_vm0, %v5496_v1  ;;  %v4134_v61 = vld [vmem:[%s5517_s9 + $0x1a0] sm:$0xff] }
  0xa2   : > { %4711 = vmatmul.mubr.msk.f32.gmra.mrb[2].mxu1 %vm236_vm1, %v5644_v25  ;;  %4935 = vmatmul.mubr.msk.f32.gmra.mrb[18].mxu0 %vm236_vm1, %v6020_v7  ;;  %v6142_v25 = vld [vmem:[%s5517_s9 + $0x188] sm:$0xff] }
  0xa3   : > { %4713 = vmatprep.mubr.msk.f32.mxu1 %vm236_vm1, %v5650_v27  ;;  %4937 = vmatprep.mubr.msk.f32.mxu0 %vm236_vm1, %v6023_v10 }
  0xa6   : > { %4714 = vmatmul.mubr.msk.f32.gmra.mrb[4].mxu1 %vm236_vm1, %v5668_v30  ;;  %4938 = vmatmul.mubr.msk.f32.gmra.mrb[20].mxu0 %vm236_vm1, %v6034_v57 }
  0xa7   : > { %4716 = vmatprep.mubr.msk.f32.mxu1 %vm236_vm1, %v5676_v32  ;;  %4940 = vmatprep.mubr.msk.f32.mxu0 %vm236_vm1, %v6037_v51 }
  0xaa   : > { %4717 = vmatmul.mubr.msk.f32.gmra.mrb[6].mxu1 %vm236_vm1, %v5692_v34  ;;  %4941 = vmatmul.mubr.msk.f32.gmra.mrb[22].mxu0 %vm236_vm1, %v6048_v47 }
  0xab   : > { %4719 = vmatprep.mubr.msk.f32.mxu1 %vm236_vm1, %v5698_v36  ;;  %4943 = vmatprep.mubr.msk.f32.mxu0 %vm236_vm1, %v6051_v43 }
  0xae   : > { %4720 = vmatmul.mubr.msk.f32.gmra.mrb[8].mxu1 %vm236_vm1, %v5712_v38  ;;  %4944 = vmatmul.mubr.msk.f32.gmra.mrb[24].mxu0 %vm236_vm1, %v6062_v39 }
  0xaf   : > { %4722 = vmatprep.mubr.msk.f32.mxu1 %vm236_vm1, %v5718_v40  ;;  %4946 = vmatprep.mubr.msk.f32.mxu0 %vm236_vm1, %v6065_v35 }
  0xb2   : > { %4723 = vmatmul.mubr.msk.f32.gmra.mrb[10].mxu1 %vm236_vm1, %v5732_v42  ;;  %4947 = vmatmul.mubr.msk.f32.gmra.mrb[26].mxu0 %vm236_vm1, %v6076_v62 }
  0xb3   : > { %4725 = vmatprep.mubr.msk.f32.mxu1 %vm236_vm1, %v5738_v44  ;;  %4949 = vmatprep.mubr.msk.f32.mxu0 %vm236_vm1, %v6131_v24 }
  0xb6   : > { %4726 = vmatmul.mubr.msk.f32.gmra.mrb[12].mxu1 %vm236_vm1, %v5752_v46  ;;  %4950 = vmatmul.mubr.msk.f32.gmra.mrb[28].mxu0 %vm236_vm1, %v6142_v25 }
  0xb7   : > { %4728 = vmatprep.mubr.msk.f32.mxu1 %vm236_vm1, %v5758_v48  ;;  %4952 = vmatprep.mubr.msk.f32.mxu0 %vm236_vm1, %v4133_v33  ;;  %v6691_v33 = vld [vmem:[#allocation13_spill] sm:$0xff] }
  0xba   : > { %4729 = vmatmul.mubr.msk.f32.gmra.mrb[14].mxu1 %vm236_vm1, %v5772_v50  ;;  %4953 = vmatmul.mubr.msk.f32.gmra.mrb[30].mxu0 %vm236_vm1, %v4134_v61  ;;  %v6692_v61 = vld [vmem:[#allocation26_spill] sm:$0xff] }
  0xbb   : > { %4731 = vmatprep.mubr.msk.f32.mxu1 %vm236_vm1, %v5778_v52  ;;  %4957 = vmatprep.mubr.msk.f32.mxu0 %vm236_vm1, %v5526_v8  ;;  %v6674_v8 = vld [vmem:[#allocation30_spill] sm:$0xff] }
  0xbe   : > { %4732 = vmatmul.mubr.msk.f32.gmra.mrb[16].mxu1 %vm236_vm1, %v5792_v54  ;;  %4958 = vmatmul.mubr.msk.f32.vlgmr.msra.gmra.mrb[0].mxu0 %vm236_vm1, %v5541_v11  ;;  %v6675_v11 = vld [vmem:[#allocation5_spill] sm:$0xff] }
  0xbf   : > { %5006 = vmatpush3.msk.msra.mxu0 %vm333_vm0, %v5977_v37  ;;  %4734 = vmatprep.mubr.msk.f32.mxu1 %vm236_vm1, %v5796_v56  ;;  %v6689_v37 = vld [vmem:[#allocation12_spill] sm:$0xff] }
  0xc0   : > { %4960 = vmatprep.mubr.msk.f32.mxu0 %vm236_vm1, %v5547_v12  ;;  %v6676_v12 = vld [vmem:[#allocation18_spill] sm:$0xff] }
  0xc2   : > { %4735 = vmatmul.mubr.msk.f32.gmra.mrb[18].mxu1 %vm236_vm1, %v5807_v58  ;;  %4961 = vmatmul.mubr.msk.f32.gmra.mrb[2].mxu0 %vm236_vm1, %v5560_v13  ;;  %v6677_v13 = vld [vmem:[#allocation6_spill] sm:$0xff] }
  0xc3   : > { %4737 = vmatprep.mubr.msk.f32.mxu1 %vm236_vm1, %v5813_v60  ;;  %4963 = vmatprep.mubr.msk.f32.mxu0 %vm236_vm1, %v5563_v14  ;;  %v6678_v14 = vld [vmem:[#allocation19_spill] sm:$0xff] }
  0xc6   : > { %4738 = vmatmul.mubr.msk.f32.gmra.mrb[20].mxu1 %vm236_vm1, %v5831_v63  ;;  %4964 = vmatmul.mubr.msk.f32.gmra.mrb[4].mxu0 %vm236_vm1, %v5574_v15  ;;  %v6679_v15 = vld [vmem:[#allocation7_spill] sm:$0xff] }
  0xc7   : > { %4740 = vmatprep.mubr.msk.f32.mxu1 %vm236_vm1, %v5839_v2  ;;  %4966 = vmatprep.mubr.msk.f32.mxu0 %vm236_vm1, %v5577_v16  ;;  %v6680_v16 = vld [vmem:[#allocation20_spill] sm:$0xff] }
  0xca   : > { %4741 = vmatmul.mubr.msk.f32.gmra.mrb[22].mxu1 %vm236_vm1, %v5855_v4  ;;  %4967 = vmatmul.mubr.msk.f32.gmra.mrb[6].mxu0 %vm236_vm1, %v5588_v17  ;;  %v6681_v17 = vld [vmem:[#allocation8_spill] sm:$0xff] }
  0xcb   : > { %4743 = vmatprep.mubr.msk.f32.mxu1 %vm236_vm1, %v5861_v6  ;;  %4969 = vmatprep.mubr.msk.f32.mxu0 %vm236_vm1, %v5591_v18  ;;  %v6682_v18 = vld [vmem:[#allocation21_spill] sm:$0xff] }
  0xce   : > { %4744 = vmatmul.mubr.msk.f32.gmra.mrb[24].mxu1 %vm236_vm1, %v5875_v9  ;;  %4970 = vmatmul.mubr.msk.f32.gmra.mrb[8].mxu0 %vm236_vm1, %v5602_v19  ;;  %v6683_v19 = vld [vmem:[#allocation9_spill] sm:$0xff] }
  0xcf   : > { %4746 = vmatprep.mubr.msk.f32.mxu1 %vm236_vm1, %v5881_v55  ;;  %4972 = vmatprep.mubr.msk.f32.mxu0 %vm236_vm1, %v5605_v20  ;;  %v6684_v20 = vld [vmem:[#allocation22_spill] sm:$0xff] }
  0xd2   : > { %4747 = vmatmul.mubr.msk.f32.gmra.mrb[26].mxu1 %vm236_vm1, %v5895_v53  ;;  %4973 = vmatmul.mubr.msk.f32.gmra.mrb[10].mxu0 %vm236_vm1, %v5616_v21  ;;  %v6685_v21 = vld [vmem:[#allocation10_spill] sm:$0xff] }
  0xd3   : > { %4749 = vmatprep.mubr.msk.f32.mxu1 %vm236_vm1, %v5901_v49  ;;  %4975 = vmatprep.mubr.msk.f32.mxu0 %vm236_vm1, %v5619_v22  ;;  %v6687_v22 = vld [vmem:[#allocation11_spill] sm:$0xff] }
  0xd6   : > { %4750 = vmatmul.mubr.msk.f32.gmra.mrb[28].mxu1 %vm236_vm1, %v5915_v45  ;;  %4976 = vmatmul.mubr.msk.f32.gmra.mrb[12].mxu0 %vm236_vm1, %v5630_v23  ;;  %v6688_v23 = vld [vmem:[#allocation24_spill] sm:$0xff] }
  0xd7   : > { %4752 = vmatprep.mubr.msk.f32.mxu1 %vm236_vm1, %v5921_v41  ;;  %4978 = vmatprep.mubr.msk.f32.mxu0 %vm236_vm1, %v5647_v26 }
  0xda   : > { %4753 = vmatmul.mubr.msk.f32.gmra.mrb[30].mxu1 %vm236_vm1, %v6674_v8  ;;  %4979 = vmatmul.mubr.msk.f32.gmra.mrb[14].mxu0 %vm236_vm1, %v6675_v11  ;;  %v6701_v8 = vld [vmem:[#allocation33_spill] sm:$0xff] }
  0xdb   : > { %4757 = vmatprep.mubr.msk.f32.mxu1 %vm236_vm1, %v6676_v12  ;;  %4981 = vmatprep.mubr.msk.f32.mxu0 %vm236_vm1, %v6677_v13  ;;  %v6693_v12 = vld [vmem:[#allocation14_spill] sm:$0xff] }
  0xde   : > { %4758 = vmatmul.mubr.msk.f32.vlgmr.msra.gmra.mrb[0].mxu1 %vm236_vm1, %v6678_v14  ;;  %4982 = vmatmul.mubr.msk.f32.gmra.mrb[16].mxu0 %vm236_vm1, %v6679_v15  ;;  %v6694_v14 = vld [vmem:[#allocation27_spill] sm:$0xff] }
  0xdf   : > { %5056 = vmatpush3.msk.msra.mxu1 %vm333_vm0, %v5496_v1  ;;  %4760 = vmatprep.mubr.msk.f32.mxu1 %vm236_vm1, %v6680_v16  ;;  %v6686_v1 = vld [vmem:[#allocation23_spill] sm:$0xff] }
  0xe0   : > { %4984 = vmatprep.mubr.msk.f32.mxu0 %vm236_vm1, %v6681_v17  ;;  %v6695_v16 = vld [vmem:[#allocation15_spill] sm:$0xff] }
  0xe2   : > { %4761 = vmatmul.mubr.msk.f32.gmra.mrb[2].mxu1 %vm236_vm1, %v6682_v18  ;;  %4985 = vmatmul.mubr.msk.f32.gmra.mrb[18].mxu0 %vm236_vm1, %v6683_v19  ;;  %v6696_v18 = vld [vmem:[#allocation28_spill] sm:$0xff] }
  0xe3   : > { %4763 = vmatprep.mubr.msk.f32.mxu1 %vm236_vm1, %v6684_v20  ;;  %4987 = vmatprep.mubr.msk.f32.mxu0 %vm236_vm1, %v6685_v21  ;;  %v6697_v20 = vld [vmem:[#allocation16_spill] sm:$0xff] }
  0xe6   : > { %4764 = vmatmul.mubr.msk.f32.gmra.mrb[4].mxu1 %vm236_vm1, %v6686_v1  ;;  %4988 = vmatmul.mubr.msk.f32.gmra.mrb[20].mxu0 %vm236_vm1, %v6687_v22  ;;  %v6269_v1 = vld [vmem:[%s5517_s9 + $0x181] sm:$0xff] }
  0xe7   : > { %4766 = vmatprep.mubr.msk.f32.mxu1 %vm236_vm1, %v6688_v23  ;;  %4990 = vmatprep.mubr.msk.f32.mxu0 %vm236_vm1, %v6689_v37  ;;  %v6698_v23 = vld [vmem:[#allocation29_spill] sm:$0xff] }
  0xea   : > { %4767 = vmatmul.mubr.msk.f32.gmra.mrb[6].mxu1 %vm236_vm1, %v6690_v3  ;;  %4991 = vmatmul.mubr.msk.f32.gmra.mrb[22].mxu0 %vm236_vm1, %v6691_v33  ;;  %v6699_v3 = vld [vmem:[#allocation17_spill] sm:$0xff] }
  0xeb   : > { %4769 = vmatprep.mubr.msk.f32.mxu1 %vm236_vm1, %v6692_v61  ;;  %4993 = vmatprep.mubr.msk.f32.mxu0 %vm236_vm1, %v6693_v12  ;;  %v6700_v61 = vld [vmem:[#allocation31_spill] sm:$0xff] }
  0xee   : > { %4770 = vmatmul.mubr.msk.f32.gmra.mrb[8].mxu1 %vm236_vm1, %v6694_v14  ;;  %4994 = vmatmul.mubr.msk.f32.gmra.mrb[24].mxu0 %vm236_vm1, %v6695_v16  ;;  %v6280_v14 = vld [vmem:[%s5517_s9 + $0x189] sm:$0xff] }
  0xef   : > { %4772 = vmatprep.mubr.msk.f32.mxu1 %vm236_vm1, %v6696_v18  ;;  %4996 = vmatprep.mubr.msk.f32.mxu0 %vm236_vm1, %v6697_v20  ;;  %v4199_v18 = vld [vmem:[%s5517_s9 + $0x199] sm:$0xff] }
  0xf2   : > { %4773 = vmatmul.mubr.msk.f32.gmra.mrb[10].mxu1 %vm236_vm1, %v6698_v23  ;;  %4997 = vmatmul.mubr.msk.f32.gmra.mrb[26].mxu0 %vm236_vm1, %v6699_v3  ;;  %v4200_v23 = vld [vmem:[%s5517_s9 + $0x1a1] sm:$0xff]  ;;  %v6702_v3 = vld [vmem:[#allocation35_spill] sm:$0xff] }
  0xf3   : > { %4775 = vmatprep.mubr.msk.f32.mxu1 %vm236_vm1, %v6700_v61  ;;  %4999 = vmatprep.mubr.msk.f32.mxu0 %vm236_vm1, %v6269_v1 }
  0xf6   : > { %4776 = vmatmul.mubr.msk.f32.gmra.mrb[12].mxu1 %vm236_vm1, %v6701_v8  ;;  %5000 = vmatmul.mubr.msk.f32.gmra.mrb[28].mxu0 %vm236_vm1, %v6280_v14 }
  0xf7   : > { %4778 = vmatprep.mubr.msk.f32.mxu1 %vm236_vm1, %v5958_v59  ;;  %5002 = vmatprep.mubr.msk.f32.mxu0 %vm236_vm1, %v4199_v18 }
  0xfa   : > { %4779 = vmatmul.mubr.msk.f32.gmra.mrb[14].mxu1 %vm236_vm1, %v6702_v3  ;;  %5003 = vmatmul.mubr.msk.f32.gmra.mrb[30].mxu0 %vm236_vm1, %v4200_v23 }
  0xfb   : > { %4781 = vmatprep.mubr.msk.f32.mxu1 %vm236_vm1, %v5972_v29  ;;  %5007 = vmatprep.mubr.msk.f32.mxu0 %vm236_vm1, %v5650_v27  ;;  %v6704_v27 = vld [vmem:[#allocation32_spill] sm:$0xff] }
  0xfc   : > { %v4265_v29 = vld [vmem:[%s5517_s9 + $0x19a] sm:$0xff] }
  0xfe   : > { %4782 = vmatmul.mubr.msk.f32.gmra.mrb[16].mxu1 %vm236_vm1, %v5988_v31  ;;  %5008 = vmatmul.mubr.msk.f32.vlgmr.msra.gmra.mrb[0].mxu0 %vm236_vm1, %v5668_v30  ;;  %v6705_v30 = vld [vmem:[#allocation17_spill] sm:$0xff]  ;;  %v6706_v31 = vld [vmem:[#allocation34_spill] sm:$0xff] }
  0xff   : > { %4784 = vmatprep.mubr.msk.f32.mxu1 %vm236_vm1, %v5993_v0  ;;  %5010 = vmatprep.mubr.msk.f32.mxu0 %vm236_vm1, %v5676_v32  ;;  %v4266_v32 = vld [vmem:[%s5517_s9 + $0x1a2] sm:$0xff] }
 0x102   : > { %4785 = vmatmul.mubr.msk.f32.gmra.mrb[18].mxu1 %vm236_vm1, %v6006_v28  ;;  %5011 = vmatmul.mubr.msk.f32.gmra.mrb[2].mxu0 %vm236_vm1, %v5692_v34 }
 0x103   : > { %4787 = vmatprep.mubr.msk.f32.mxu1 %vm236_vm1, %v6009_v5  ;;  %5013 = vmatprep.mubr.msk.f32.mxu0 %vm236_vm1, %v5698_v36 }
 0x106   : > { %4788 = vmatmul.mubr.msk.f32.gmra.mrb[20].mxu1 %vm236_vm1, %v6020_v7  ;;  %5014 = vmatmul.mubr.msk.f32.gmra.mrb[4].mxu0 %vm236_vm1, %v5712_v38 }
 0x107   : > { %4790 = vmatprep.mubr.msk.f32.mxu1 %vm236_vm1, %v6023_v10  ;;  %5016 = vmatprep.mubr.msk.f32.mxu0 %vm236_vm1, %v5718_v40 }
 0x10a   : > { %4791 = vmatmul.mubr.msk.f32.gmra.mrb[22].mxu1 %vm236_vm1, %v6034_v57  ;;  %5017 = vmatmul.mubr.msk.f32.gmra.mrb[6].mxu0 %vm236_vm1, %v5732_v42 }
 0x10b   : > { %4793 = vmatprep.mubr.msk.f32.mxu1 %vm236_vm1, %v6037_v51  ;;  %5019 = vmatprep.mubr.msk.f32.mxu0 %vm236_vm1, %v5738_v44 }
 0x10e   : > { %4794 = vmatmul.mubr.msk.f32.gmra.mrb[24].mxu1 %vm236_vm1, %v6048_v47  ;;  %5020 = vmatmul.mubr.msk.f32.gmra.mrb[8].mxu0 %vm236_vm1, %v5752_v46 }
 0x10f   : > { %4796 = vmatprep.mubr.msk.f32.mxu1 %vm236_vm1, %v6051_v43  ;;  %5022 = vmatprep.mubr.msk.f32.mxu0 %vm236_vm1, %v5758_v48 }
 0x112   : > { %4797 = vmatmul.mubr.msk.f32.gmra.mrb[26].mxu1 %vm236_vm1, %v6062_v39  ;;  %5023 = vmatmul.mubr.msk.f32.gmra.mrb[10].mxu0 %vm236_vm1, %v5772_v50 }
 0x113   : > { %4799 = vmatprep.mubr.msk.f32.mxu1 %vm236_vm1, %v6065_v35  ;;  %5025 = vmatprep.mubr.msk.f32.mxu0 %vm236_vm1, %v5778_v52  ;;  %v6434_v52 = vld [vmem:[%s6594_s2] ss:$0 sm:$0xff] }
 0x116   : > { %4800 = vmatmul.mubr.msk.f32.gmra.mrb[28].mxu1 %vm236_vm1, %v6076_v62  ;;  %5026 = vmatmul.mubr.msk.f32.gmra.mrb[12].mxu0 %vm236_vm1, %v5792_v54 }
 0x117   : > { %4802 = vmatprep.mubr.msk.f32.mxu1 %vm236_vm1, %v6131_v24  ;;  %5028 = vmatprep.mubr.msk.f32.mxu0 %vm236_vm1, %v5796_v56 }
 0x11a   : > { %4803 = vmatmul.mubr.msk.f32.gmra.mrb[30].mxu1 %vm236_vm1, %v6142_v25  ;;  %5029 = vmatmul.mubr.msk.f32.gmra.mrb[14].mxu0 %vm236_vm1, %v5807_v58 }
 0x11b   : > { %4831 = vmatprep.mubr.msk.f32.mxu1 %vm236_vm1, %v5647_v26  ;;  %5031 = vmatprep.mubr.msk.f32.mxu0 %vm236_vm1, %v5813_v60  ;;  %v6703_v26 = vld [vmem:[#allocation30_spill] sm:$0xff] }
 0x11e   : > { %4832 = vmatmul.mubr.msk.f32.vlgmr.msra.gmra.mrb[16].mxu1 %vm236_vm1, %v6675_v11  ;;  %5032 = vmatmul.mubr.msk.f32.gmra.mrb[16].mxu0 %vm236_vm1, %v5831_v63 }
 0x11f   : > { %4834 = vmatprep.mubr.msk.f32.mxu1 %vm236_vm1, %v6677_v13  ;;  %5034 = vmatprep.mubr.msk.f32.mxu0 %vm236_vm1, %v5839_v2 }
 0x122   : > { %4835 = vmatmul.mubr.msk.f32.gmra.mrb[18].mxu1 %vm236_vm1, %v6679_v15  ;;  %5035 = vmatmul.mubr.msk.f32.gmra.mrb[18].mxu0 %vm236_vm1, %v5855_v4 }
 0x123   : > { %4837 = vmatprep.mubr.msk.f32.mxu1 %vm236_vm1, %v6681_v17  ;;  %5037 = vmatprep.mubr.msk.f32.mxu0 %vm236_vm1, %v5861_v6 }
 0x126   : > { %4838 = vmatmul.mubr.msk.f32.gmra.mrb[20].mxu1 %vm236_vm1, %v6683_v19  ;;  %5038 = vmatmul.mubr.msk.f32.gmra.mrb[20].mxu0 %vm236_vm1, %v5875_v9 }
 0x127   : > { %4840 = vmatprep.mubr.msk.f32.mxu1 %vm236_vm1, %v6685_v21  ;;  %5040 = vmatprep.mubr.msk.f32.mxu0 %vm236_vm1, %v5881_v55 }
 0x12a   : > { %4841 = vmatmul.mubr.msk.f32.gmra.mrb[22].mxu1 %vm236_vm1, %v6687_v22  ;;  %5041 = vmatmul.mubr.msk.f32.gmra.mrb[22].mxu0 %vm236_vm1, %v5895_v53 }
 0x12b   : > { %4843 = vmatprep.mubr.msk.f32.mxu1 %vm236_vm1, %v6689_v37  ;;  %5043 = vmatprep.mubr.msk.f32.mxu0 %vm236_vm1, %v5901_v49 }
 0x12e   : > { %4844 = vmatmul.mubr.msk.f32.gmra.mrb[24].mxu1 %vm236_vm1, %v6691_v33  ;;  %5044 = vmatmul.mubr.msk.f32.gmra.mrb[24].mxu0 %vm236_vm1, %v5915_v45 }
 0x12f   : > { %4846 = vmatprep.mubr.msk.f32.mxu1 %vm236_vm1, %v6693_v12  ;;  %5046 = vmatprep.mubr.msk.f32.mxu0 %vm236_vm1, %v5921_v41 }
 0x132   : > { %4847 = vmatmul.mubr.msk.f32.gmra.mrb[26].mxu1 %vm236_vm1, %v6695_v16  ;;  %5047 = vmatmul.mubr.msk.f32.gmra.mrb[26].mxu0 %vm236_vm1, %v6703_v26 }
 0x133   : > { %4849 = vmatprep.mubr.msk.f32.mxu1 %vm236_vm1, %v6697_v20  ;;  %5049 = vmatprep.mubr.msk.f32.mxu0 %vm236_vm1, %v6704_v27 }
 0x136   : > { %4850 = vmatmul.mubr.msk.f32.gmra.mrb[28].mxu1 %vm236_vm1, %v6705_v30  ;;  %5050 = vmatmul.mubr.msk.f32.gmra.mrb[28].mxu0 %vm236_vm1, %v6706_v31 }
 0x137   : > { %4852 = vmatprep.mubr.msk.f32.mxu1 %vm236_vm1, %v6269_v1  ;;  %5052 = vmatprep.mubr.msk.f32.mxu0 %vm236_vm1, %v4265_v29 }
 0x13a   : > { %4853 = vmatmul.mubr.msk.f32.gmra.mrb[30].mxu1 %vm236_vm1, %v6280_v14  ;;  %5053 = vmatmul.mubr.msk.f32.gmra.mrb[30].mxu0 %vm236_vm1, %v4266_v32 }
 0x1b1   : > { %v4759_v34 = vpop.f32.mrb[0].mxu1 }
 0x1b2   : > { %v1476_v35 = vpop.f32.mrb[1].mxu1 }
 0x1b5   : > { %v4762_v36 = vpop.f32.mrb[2].mxu1 }
 0x1b6   : > { %v1486_v38 = vpop.f32.mrb[3].mxu1 }
 0x1b9   : > { %v4765_v39 = vpop.f32.mrb[4].mxu1 }
 0x1ba   : > { %v1496_v40 = vpop.f32.mrb[5].mxu1 }
 0x1bd   : > { %v4768_v41 = vpop.f32.mrb[6].mxu1 }
 0x1be   : > { %v1506_v42 = vpop.f32.mrb[7].mxu1 }
 0x1c1   : > { %v4771_v43 = vpop.f32.mrb[8].mxu1 }
 0x1c2   : > { %v1516_v44 = vpop.f32.mrb[9].mxu1 }
 0x1c5   : > { %v4774_v45 = vpop.f32.mrb[10].mxu1 }
 0x1c6   : > { %v1526_v46 = vpop.f32.mrb[11].mxu1 }
 0x1c9   : > { %v6422_v47 = vpop.f32.mrb[12].mxu1 }
 0x1ca   : > { %v6424_v48 = vpop.f32.mrb[13].mxu1 }
 0x1cd   : > { %v6426_v49 = vpop.f32.mrb[14].mxu1 }
 0x1ce   : > { %v6428_v50 = vpop.f32.mrb[15].mxu1 }
 0x1d1   : > { %v5009_v51 = vpop.f32.mrb[0].mxu0 }
 0x1d2   : > { %v5057_v53 = vadd.f32 %v5009_v51, %v4759_v34  ;;  %v3427_v54 = vpop.f32.mrb[1].mxu0 }
 0x1d3   : > { %v5058_v56 = vadd.f32 %v3427_v54, %v1476_v35 }
 0x1d4   : > { %v3626_v58 = vadd.f32 %v5057_v53, %v6434_v52 }
 0x1d5   : > { %v3625_v59 = vadd.f32 %v5058_v56, %v6434_v52  ;;  %v5012_v60 = vpop.f32.mrb[2].mxu0 }
 0x1d6   : > { %v3658_v62 = vmax.f32 %v3626_v58, 0.0  ;;  %v5059_v63 = vadd.f32 %v5012_v60, %v4762_v36  ;;  %v3437_v0 = vpop.f32.mrb[3].mxu0 }
 0x1d7   : > { %v3657_v2 = vmax.f32 %v3625_v59, 0.0  ;;  %v5060_v4 = vadd.f32 %v3437_v0, %v1486_v38 }
 0x1d8   : > { %3691 = vst.msk [vmem:[%s6440_s6 + $0x8] sm:$0xff] %vm3689_vm2, %v3658_v62  ;;  %v3628_v5 = vadd.f32 %v5059_v63, %v6434_v52 }
 0x1d9   : > { %3690 = vst.msk [vmem:[%s6440_s6] sm:$0xff] %vm3689_vm2, %v3657_v2  ;;  %v3627_v6 = vadd.f32 %v5060_v4, %v6434_v52  ;;  %v5015_v7 = vpop.f32.mrb[4].mxu0 }
 0x1da   : > { %v3660_v9 = vmax.f32 %v3628_v5, 0.0  ;;  %v5061_v10 = vadd.f32 %v5015_v7, %v4765_v39  ;;  %v3447_v55 = vpop.f32.mrb[5].mxu0 }
 0x1db   : > { %v3659_v57 = vmax.f32 %v3627_v6, 0.0  ;;  %v5062_v28 = vadd.f32 %v3447_v55, %v1496_v40 }
 0x1dc   : > { %3693 = vst.msk [vmem:[%s6440_s6 + $0x18] sm:$0xff] %vm3689_vm2, %v3660_v9  ;;  %v3630_v24 = vadd.f32 %v5061_v10, %v6434_v52 }
 0x1dd   : > { %3692 = vst.msk [vmem:[%s6440_s6 + $0x10] sm:$0xff] %vm3689_vm2, %v3659_v57  ;;  %v3629_v25 = vadd.f32 %v5062_v28, %v6434_v52  ;;  %v5018_v8 = vpop.f32.mrb[6].mxu0 }
 0x1de   : > { %v3662_v11 = vmax.f32 %v3630_v24, 0.0  ;;  %v5063_v13 = vadd.f32 %v5018_v8, %v4768_v41  ;;  %v3457_v15 = vpop.f32.mrb[7].mxu0 }
 0x1df   : > { %v3661_v17 = vmax.f32 %v3629_v25, 0.0  ;;  %v5064_v19 = vadd.f32 %v3457_v15, %v1506_v42 }
 0x1e0   : > { %3695 = vst.msk [vmem:[%s6440_s6 + $0x28] sm:$0xff] %vm3689_vm2, %v3662_v11  ;;  %v3632_v21 = vadd.f32 %v5063_v13, %v6434_v52 }
 0x1e1   : > { %3694 = vst.msk [vmem:[%s6440_s6 + $0x20] sm:$0xff] %vm3689_vm2, %v3661_v17  ;;  %v3631_v22 = vadd.f32 %v5064_v19, %v6434_v52  ;;  %v5021_v37 = vpop.f32.mrb[8].mxu0 }
 0x1e2   : > { %v3664_v33 = vmax.f32 %v3632_v21, 0.0  ;;  %v5065_v12 = vadd.f32 %v5021_v37, %v4771_v43  ;;  %v3467_v16 = vpop.f32.mrb[9].mxu0 }
 0x1e3   : > { %v3663_v20 = vmax.f32 %v3631_v22, 0.0  ;;  %v5066_v1 = vadd.f32 %v3467_v16, %v1516_v44 }
 0x1e4   : > { %3697 = vst.msk [vmem:[%s6440_s6 + $0x38] sm:$0xff] %vm3689_vm2, %v3664_v33  ;;  %v3634_v3 = vadd.f32 %v5065_v12, %v6434_v52 }
 0x1e5   : > { %3696 = vst.msk [vmem:[%s6440_s6 + $0x30] sm:$0xff] %vm3689_vm2, %v3663_v20  ;;  %v3633_v61 = vadd.f32 %v5066_v1, %v6434_v52  ;;  %v5024_v14 = vpop.f32.mrb[10].mxu0 }
 0x1e6   : > { %v3666_v18 = vmax.f32 %v3634_v3, 0.0  ;;  %v5067_v23 = vadd.f32 %v5024_v14, %v4774_v45  ;;  %v3477_v26 = vpop.f32.mrb[11].mxu0 }
 0x1e7   : > { %v3665_v27 = vmax.f32 %v3633_v61, 0.0  ;;  %v5068_v29 = vadd.f32 %v3477_v26, %v1526_v46 }
 0x1e8   : > { %3699 = vst.msk [vmem:[%s6440_s6 + $0x48] sm:$0xff] %vm3689_vm2, %v3666_v18  ;;  %v3636_v30 = vadd.f32 %v5067_v23, %v6434_v52 }
 0x1e9   : > { %3698 = vst.msk [vmem:[%s6440_s6 + $0x40] sm:$0xff] %vm3689_vm2, %v3665_v27  ;;  %v3635_v31 = vadd.f32 %v5068_v29, %v6434_v52  ;;  %v5027_v32 = vpop.f32.mrb[12].mxu0 }
 0x1ea   : > { %v3668_v34 = vmax.f32 %v3636_v30, 0.0  ;;  %v5069_v35 = vadd.f32 %v5027_v32, %v6422_v47  ;;  %v3487_v36 = vpop.f32.mrb[13].mxu0 }
 0x1eb   : > { %v3667_v38 = vmax.f32 %v3635_v31, 0.0  ;;  %v5070_v39 = vadd.f32 %v3487_v36, %v6424_v48 }
 0x1ec   : > { %3701 = vst.msk [vmem:[%s6440_s6 + $0x58] sm:$0xff] %vm3689_vm2, %v3668_v34  ;;  %v3638_v40 = vadd.f32 %v5069_v35, %v6434_v52 }
 0x1ed   : > { %3700 = vst.msk [vmem:[%s6440_s6 + $0x50] sm:$0xff] %vm3689_vm2, %v3667_v38  ;;  %v3637_v41 = vadd.f32 %v5070_v39, %v6434_v52  ;;  %v5030_v42 = vpop.f32.mrb[14].mxu0 }
 0x1ee   : > { %v3670_v43 = vmax.f32 %v3638_v40, 0.0  ;;  %v5071_v44 = vadd.f32 %v5030_v42, %v6426_v49  ;;  %v3497_v45 = vpop.f32.mrb[15].mxu0 }
 0x1ef   : > { %v3669_v46 = vmax.f32 %v3637_v41, 0.0  ;;  %v5072_v47 = vadd.f32 %v3497_v45, %v6428_v50 }
 0x1f0   : > { %3703 = vst.msk [vmem:[%s6440_s6 + $0x68] sm:$0xff] %vm3689_vm2, %v3670_v43  ;;  %v3640_v48 = vadd.f32 %v5071_v44, %v6434_v52 }
 0x1f1   : > { %3702 = vst.msk [vmem:[%s6440_s6 + $0x60] sm:$0xff] %vm3689_vm2, %v3669_v46  ;;  %v3639_v51 = vadd.f32 %v5072_v47, %v6434_v52  ;;  %v4833_v53 = vpop.f32.mrb[16].mxu1  ;;  %v5033_v54 = vpop.f32.mrb[16].mxu0 }
 0x1f2   : > { %v3672_v56 = vmax.f32 %v3640_v48, 0.0  ;;  %v5073_v58 = vadd.f32 %v5033_v54, %v4833_v53  ;;  %v1946_v59 = vpop.f32.mrb[17].mxu1  ;;  %v3507_v49 = vpop.f32.mrb[17].mxu0 }
 0x1f3   : > { %v3671_v60 = vmax.f32 %v3639_v51, 0.0  ;;  %v5074_v62 = vadd.f32 %v3507_v49, %v1946_v59 }
 0x1f4   : > { %3705 = vst.msk [vmem:[%s6440_s6 + $0x78] sm:$0xff] %vm3689_vm2, %v3672_v56  ;;  %v3642_v50 = vadd.f32 %v5073_v58, %v6434_v52 }
 0x1f5   : > { %3704 = vst.msk [vmem:[%s6440_s6 + $0x70] sm:$0xff] %vm3689_vm2, %v3671_v60  ;;  %v3641_v63 = vadd.f32 %v5074_v62, %v6434_v52  ;;  %v4836_v0 = vpop.f32.mrb[18].mxu1  ;;  %v5036_v2 = vpop.f32.mrb[18].mxu0 }
 0x1f6   : > { %v3674_v4 = vmax.f32 %v3642_v50, 0.0  ;;  %v5075_v5 = vadd.f32 %v5036_v2, %v4836_v0  ;;  %v1956_v6 = vpop.f32.mrb[19].mxu1  ;;  %v3517_v7 = vpop.f32.mrb[19].mxu0 }
 0x1f7   : > { %v3673_v9 = vmax.f32 %v3641_v63, 0.0  ;;  %v5076_v10 = vadd.f32 %v3517_v7, %v1956_v6 }
 0x1f8   : > { %3707 = vst.msk [vmem:[%s6440_s6 + $0x88] sm:$0xff] %vm3689_vm2, %v3674_v4  ;;  %v3644_v55 = vadd.f32 %v5075_v5, %v6434_v52 }
 0x1f9   : > { %3706 = vst.msk [vmem:[%s6440_s6 + $0x80] sm:$0xff] %vm3689_vm2, %v3673_v9  ;;  %v3643_v57 = vadd.f32 %v5076_v10, %v6434_v52  ;;  %v4839_v28 = vpop.f32.mrb[20].mxu1  ;;  %v5039_v24 = vpop.f32.mrb[20].mxu0 }
 0x1fa   : > { %v3676_v25 = vmax.f32 %v3644_v55, 0.0  ;;  %v5077_v8 = vadd.f32 %v5039_v24, %v4839_v28  ;;  %v1966_v11 = vpop.f32.mrb[21].mxu1  ;;  %v3527_v13 = vpop.f32.mrb[21].mxu0 }
 0x1fb   : > { %v3675_v15 = vmax.f32 %v3643_v57, 0.0  ;;  %v5078_v17 = vadd.f32 %v3527_v13, %v1966_v11 }
 0x1fc   : > { %3709 = vst.msk [vmem:[%s6440_s6 + $0x98] sm:$0xff] %vm3689_vm2, %v3676_v25  ;;  %v3646_v19 = vadd.f32 %v5077_v8, %v6434_v52 }
 0x1fd   : > { %3708 = vst.msk [vmem:[%s6440_s6 + $0x90] sm:$0xff] %vm3689_vm2, %v3675_v15  ;;  %v3645_v21 = vadd.f32 %v5078_v17, %v6434_v52  ;;  %v4842_v22 = vpop.f32.mrb[22].mxu1  ;;  %v5042_v37 = vpop.f32.mrb[22].mxu0 }
 0x1fe   : > { %v3678_v33 = vmax.f32 %v3646_v19, 0.0  ;;  %v5079_v12 = vadd.f32 %v5042_v37, %v4842_v22  ;;  %v1976_v16 = vpop.f32.mrb[23].mxu1  ;;  %v3537_v20 = vpop.f32.mrb[23].mxu0 }
 0x1ff   : > { %v3677_v1 = vmax.f32 %v3645_v21, 0.0  ;;  %v5080_v3 = vadd.f32 %v3537_v20, %v1976_v16 }
 0x200   : > { %3711 = vst.msk [vmem:[%s6440_s6 + $0xa8] sm:$0xff] %vm3689_vm2, %v3678_v33  ;;  %v3648_v61 = vadd.f32 %v5079_v12, %v6434_v52 }
 0x201   : > { %3710 = vst.msk [vmem:[%s6440_s6 + $0xa0] sm:$0xff] %vm3689_vm2, %v3677_v1  ;;  %v3647_v14 = vadd.f32 %v5080_v3, %v6434_v52  ;;  %v4845_v18 = vpop.f32.mrb[24].mxu1  ;;  %v5045_v23 = vpop.f32.mrb[24].mxu0 }
 0x202   : > { %v3680_v26 = vmax.f32 %v3648_v61, 0.0  ;;  %v5081_v27 = vadd.f32 %v5045_v23, %v4845_v18  ;;  %v1986_v29 = vpop.f32.mrb[25].mxu1  ;;  %v3547_v30 = vpop.f32.mrb[25].mxu0 }
 0x203   : > { %v3679_v31 = vmax.f32 %v3647_v14, 0.0  ;;  %v5082_v32 = vadd.f32 %v3547_v30, %v1986_v29 }
 0x204   : > { %3713 = vst.msk [vmem:[%s6440_s6 + $0xb8] sm:$0xff] %vm3689_vm2, %v3680_v26  ;;  %v3650_v34 = vadd.f32 %v5081_v27, %v6434_v52 }
 0x205   : > { %3712 = vst.msk [vmem:[%s6440_s6 + $0xb0] sm:$0xff] %vm3689_vm2, %v3679_v31  ;;  %v3649_v35 = vadd.f32 %v5082_v32, %v6434_v52  ;;  %v4848_v36 = vpop.f32.mrb[26].mxu1  ;;  %v5048_v38 = vpop.f32.mrb[26].mxu0 }
 0x206   : > { %v3682_v39 = vmax.f32 %v3650_v34, 0.0  ;;  %v5083_v40 = vadd.f32 %v5048_v38, %v4848_v36  ;;  %v1996_v41 = vpop.f32.mrb[27].mxu1  ;;  %v3557_v42 = vpop.f32.mrb[27].mxu0 }
 0x207   : > { %v3681_v43 = vmax.f32 %v3649_v35, 0.0  ;;  %v5084_v44 = vadd.f32 %v3557_v42, %v1996_v41 }
 0x208   : > { %3715 = vst.msk [vmem:[%s6440_s6 + $0xc8] sm:$0xff] %vm3689_vm2, %v3682_v39  ;;  %v3652_v45 = vadd.f32 %v5083_v40, %v6434_v52 }
 0x209   : > { %3714 = vst.msk [vmem:[%s6440_s6 + $0xc0] sm:$0xff] %vm3689_vm2, %v3681_v43  ;;  %v3651_v46 = vadd.f32 %v5084_v44, %v6434_v52  ;;  %v4851_v47 = vpop.f32.mrb[28].mxu1  ;;  %v5051_v48 = vpop.f32.mrb[28].mxu0 }
 0x20a   : > { %v3684_v51 = vmax.f32 %v3652_v45, 0.0  ;;  %v5085_v53 = vadd.f32 %v5051_v48, %v4851_v47  ;;  %v2006_v54 = vpop.f32.mrb[29].mxu1  ;;  %v3567_v56 = vpop.f32.mrb[29].mxu0 }
 0x20b   : > { %v3683_v58 = vmax.f32 %v3651_v46, 0.0  ;;  %v5086_v59 = vadd.f32 %v3567_v56, %v2006_v54 }
 0x20c   : > { %3717 = vst.msk [vmem:[%s6440_s6 + $0xd8] sm:$0xff] %vm3689_vm2, %v3684_v51  ;;  %v3654_v49 = vadd.f32 %v5085_v53, %v6434_v52 }
 0x20d   : > { %3716 = vst.msk [vmem:[%s6440_s6 + $0xd0] sm:$0xff] %vm3689_vm2, %v3683_v58  ;;  %v3653_v60 = vadd.f32 %v5086_v59, %v6434_v52  ;;  %v4854_v62 = vpop.f32.mrb[30].mxu1  ;;  %v5054_v50 = vpop.f32.mrb[30].mxu0 }
 0x20e   : > { %v3686_v63 = vmax.f32 %v3654_v49, 0.0  ;;  %v5087_v0 = vadd.f32 %v5054_v50, %v4854_v62  ;;  %v2016_v2 = vpop.f32.mrb[31].mxu1  ;;  %v3577_v4 = vpop.f32.mrb[31].mxu0 }
 0x20f   : > { %v3685_v5 = vmax.f32 %v3653_v60, 0.0  ;;  %v5088_v6 = vadd.f32 %v3577_v4, %v2016_v2 }
 0x210   : > { %3719 = vst.msk [vmem:[%s6440_s6 + $0xe8] sm:$0xff] %vm3689_vm2, %v3686_v63  ;;  %v3656_v7 = vadd.f32 %v5087_v0, %v6434_v52 }
 0x211   : > { %3718 = vst.msk [vmem:[%s6440_s6 + $0xe0] sm:$0xff] %vm3689_vm2, %v3685_v5  ;;  %v3655_v9 = vadd.f32 %v5088_v6, %v6434_v52 }
 0x212   : > { %v3688_v10 = vmax.f32 %v3656_v7, 0.0 }
 0x213   : > { %v3687_v55 = vmax.f32 %v3655_v9, 0.0 }
 0x214   : > { %3721 = vst.msk [vmem:[%s6440_s6 + $0xf8] sm:$0xff] %vm3689_vm2, %v3688_v10 }
 0x215   : > { %3720 = vst.msk [vmem:[%s6440_s6 + $0xf0] sm:$0xff] %vm3689_vm2, %v3687_v55 }
 0x216   : > { %5368 = shalt.err (!%p5365_p3)
}
 0x217   : > { %s5369_s25 = scalar_lea.hbm %s6541_s11, 4096  ;;  %s5373_s28 = scalar_lea.hbm %s6595_s3, 8192 }
 0x218   : > { %p5370_p4 = scmp.ne.s32.totalorder %s6541_s11, %s5369_s25  ;;  %p5374_p9 = scmp.lt.u32.totalorder %s6541_s11, %s6595_s3 }
 0x219   : > { %p5375_p10 = scmp.lt.u32.totalorder %s5373_s28, %s5369_s25  ;;  %p5377_p12 = scmp.lt.u32.totalorder %s5369_s25, %s6541_s11 }
 0x21a   : > { %p5371_p7 = pnand %p5370_p4, %p5480_p5 }
 0x21b   : > { %p5376_p11 = por %p5375_p10, %p5374_p9 }
 0x21c   : > { %p5372_p8 = pneg %p5371_p7 }
 0x21d   : > { %p5378_p13 = por %p5377_p12, %p5376_p11 }
 0x21f   : > { %p5379_p0 = pnand %p5378_p13, %p5372_p8 }
 0x221   : > { %5382 = shalt.err (!%p5379_p0)
}
 0x222   : > { %s5420_s4 = smov 128   ;;  %s5421_s5 = smov 8  }
 0x223   : > { %5314 = dma.vmem_to_hbm [thread:$0]  (%p5480_p5), %s6543_s8, 4096, %s6541_s11, %s6551_s16, %s5420_s4, %s5420_s4, %s5421_s5  }
 0x224 PF: > { %p5320_p1 = scmp.ge.s32.totalorder %s5417_s15, 2  ;;  %s3751_s6 = sand.u32 1, %s5405_s12  }
 0x225   : > { %s3752_s7 = scalar_lea.sflag [#allocation3], %s3751_s6 }
 0x226   : > { %p5317_p2 = pnand %p5320_p1, %p5484_p6 }
 0x228   : > { %5400 = dma.done.wait (!%p5317_p2), %s3752_s7, 4096  }
 0x229   : > { %5402 = vsyncadd (!%p5317_p2), %s3752_s7, 4294963200  ;;  %p13_p3 = scmp.ge.s32.totalorder %s5467_s18, 4   ;;  %s6707_s12 = smov %s5409_s13 }
 0x22a   : > { %s6708_s13 = smov %s5413_s14  ;;  %s6709_s14 = smov %s5478_s21 }
 0x22b   : > { %s6710_s15 = smov %s5467_s18  ;;  %15 = sbr.rel (!%p13_p3) target bundleno = 3 (0x3), region = 77 }
 0x232   :  { %3757 = vsyncpa [#allocation3], 1 }
 0x233   :  { %3759 = vsyncpa [#allocation3 + $0x1], 1 }

</bundles_post_ra>
